<compile_context>
chip_gen: v5e
topology: v5e:2x2
jax: 0.10.0
libtpu: 0.0.40
codegen_flags: <defaults>
</compile_context>

<pallas_src>
import functools

import jax
import jax.numpy as jnp
from jax import lax
from jax.experimental import pallas as pl
from jax.experimental.pallas import tpu as pltpu


# ----------------------------------------------------------------------------
# Fused kernel (transposed, lane-dense layout: features on sublanes,
# nodes/edges/graphs on lanes padded to 128)
# ----------------------------------------------------------------------------
def state_embed_kernel(xin_ref, gmat_ref, a_ref, b_ref, smat_ref, pmat_ref,
                       w1t_ref, b1_ref, w2t_ref, b2_ref,
                       wpack_ref, broot_ref,
                       wit_ref, bi_ref, bh_ref,
                       o_ref, *, nemb, n_nodes, num_conv_steps):
    n_pad = xin_ref.shape[1]

    # --- block2emb: Linear -> LeakyReLU(0.01) -> Linear (weights from the left)
    x = xin_ref[...]                                                   # (nemb+nvec, N_pad)
    t = jnp.dot(w1t_ref[...], x, preferred_element_type=jnp.float32) + b1_ref[...]
    t = jnp.where(t > 0, t, 0.01 * t)
    h = jnp.dot(w2t_ref[...], t, preferred_element_type=jnp.float32) + b2_ref[...]

    # Mask padded node columns (biases above would otherwise make them nonzero).
    col = lax.broadcasted_iota(jnp.int32, (1, n_pad), 1)
    node_mask = (col < n_nodes).astype(jnp.float32)                    # (1, N_pad)
    h = h * node_mask

    # Loop-invariant operands: read once, reuse every step.
    gmat = gmat_ref[...]        # (N_pad, E_pad) gather-by-src operator
    smat = smat_ref[...]        # (E_pad, N_pad) mean-scatter operator (1/deg baked in)
    a_t = a_ref[...]            # (nemb, E_pad)
    b_t = b_ref[...]            # (nemb, E_pad)
    wpack = wpack_ref[...]      # (4*nemb, nemb) = [Wroot^T ; Wh^T (r|z|n)]
    wit = wit_ref[...]          # (3*nemb, nemb) = Wi^T (r|z|n)
    broot = broot_ref[...]      # (nemb, 1)
    bi = bi_ref[...]            # (3*nemb, 1)
    bh = bh_ref[...]            # (3*nemb, 1)

    def conv_gru_step(_, h):
        # gather source-node features per edge: (nemb, E_pad)
        xs = jnp.dot(h, gmat, preferred_element_type=jnp.float32)
        # NNConv message: x_src @ outer(a_e, b_e) == (x_src . a_e) * b_e
        msg = jnp.sum(xs * a_t, axis=0, keepdims=True) * b_t           # (nemb, E_pad)
        # one packed 128-row matmul feeds both the conv root term and the GRU gh
        hz = jnp.dot(wpack, h, preferred_element_type=jnp.float32)     # (4*nemb, N_pad)
        conv = (jnp.dot(msg, smat, preferred_element_type=jnp.float32) # mean over in-edges
                + hz[:nemb] + broot)
        m = jnp.where(conv > 0, conv, 0.01 * conv)                     # F.leaky_relu

        # GRU cell, PyTorch gate order (r, z, n)
        gi = jnp.dot(wit, m, preferred_element_type=jnp.float32) + bi  # (3*nemb, N_pad)
        gh = hz[nemb:] + bh                                            # (3*nemb, N_pad)
        r = jax.nn.sigmoid(gi[:nemb] + gh[:nemb])
        z = jax.nn.sigmoid(gi[nemb:2 * nemb] + gh[nemb:2 * nemb])
        n = jnp.tanh(gi[2 * nemb:] + r * gh[2 * nemb:])
        return ((1.0 - z) * n + z * h) * node_mask                     # new hidden == output

    h = lax.fori_loop(0, num_conv_steps, conv_gru_step, h,
                      unroll=(num_conv_steps <= 4))

    # global_mean_pool: (nemb, G_pad) lane-dense output (unmasked stores)
    o_ref[...] = jnp.dot(h, pmat_ref[...], preferred_element_type=jnp.float32)


# ----------------------------------------------------------------------------
# pallas_call wrapper (single call, full-array blocks, grid=(1,))
# ----------------------------------------------------------------------------
def _full_spec(shape):
    return pl.BlockSpec(tuple(shape), lambda i, _nd=len(shape): (0,) * _nd)


def _round_up(n, m):
    return ((n + m - 1) // m) * m


def state_embedding_forward(params, graph, vec_data, nemb, num_conv_steps):
    # ---- glue (plain JAX): embedding lookups, one-hot operators, transposes ----
    x_emb = jnp.take(params['blockemb'], graph['x'], axis=0)              # (N, nemb)
    bond = jnp.take(params['bondemb'], graph['edge_attr'], axis=0)        # (E, 2, nemb)
    a_e, b_e = bond[:, 0, :], bond[:, 1, :]
    batch_vec = vec_data[graph['batch']]                                  # (N, nvec)  (version='v1')
    x_in = jnp.concatenate([x_emb, batch_vec], axis=1)                    # (N, nemb+nvec)

    N, E = x_emb.shape[0], a_e.shape[0]
    num_graphs = vec_data.shape[0]
    n_pad = _round_up(N, 128)
    e_pad = _round_up(E, 128)
    g_pad = _round_up(num_graphs, 128)

    def pad_cols(x, cols):
        return jnp.pad(x, ((0, 0), (0, cols - x.shape[1])))

    # transposed, lane-dense operands: feature axis on sublanes, N/E/G on lanes
    x_in_t = pad_cols(x_in.T, n_pad)                                      # (nemb+nvec, N_pad)
    a_t = pad_cols(a_e.T, e_pad)                                          # (nemb, E_pad)
    b_t = pad_cols(b_e.T, e_pad)                                          # (nemb, E_pad)

    src, tgt = graph['edge_index'][0], graph['edge_index'][1]
    # gather operator: (N_pad, E_pad), column e is one-hot of src[e]
    gmat = pad_cols(jax.nn.one_hot(src, n_pad, dtype=jnp.float32).T, e_pad)
    # mean-scatter operator: (E_pad, N_pad), 1/in-degree baked into the 1-entries
    tgt_oh = jax.nn.one_hot(tgt, n_pad, dtype=jnp.float32)                # (E, N_pad)
    deg = jnp.sum(tgt_oh, axis=0)
    smat = jnp.pad(tgt_oh / jnp.maximum(deg, 1.0)[None, :],
                   ((0, e_pad - E), (0, 0)))
    # mean-pool operator: (N_pad, G_pad)
    batch_oh = jax.nn.one_hot(graph['batch'], num_graphs, dtype=jnp.float32)
    counts = jnp.sum(batch_oh, axis=0)
    pmat = jnp.pad(batch_oh / jnp.maximum(counts, 1.0)[None, :],
                   ((0, n_pad - N), (0, g_pad - num_graphs)))

    # transposed / packed weight slabs and column biases
    w1t = params['b2e_w1'].T
    b1c = params['b2e_b1'].T                                              # (nemb, 1)
    w2t = params['b2e_w2'].T
    b2c = params['b2e_b2'].T
    wpack = jnp.concatenate([params['conv_wroot'].T, params['gru_wh'].T], axis=0)  # (4*nemb, nemb)
    brootc = params['conv_b'].T                                           # (nemb, 1)
    wit = params['gru_wi'].T                                              # (3*nemb, nemb)
    bic = params['gru_bi'].T                                              # (3*nemb, 1)
    bhc = params['gru_bh'].T                                              # (3*nemb, 1)

    inputs = [x_in_t, gmat, a_t, b_t, smat, pmat,
              w1t, b1c, w2t, b2c, wpack, brootc, wit, bic, bhc]

    nin = x_in_t.shape[0]
    flops = int(
        2 * nin * nemb * n_pad + 2 * nemb * nemb * n_pad                  # block2emb
        + num_conv_steps * (2 * nemb * n_pad * e_pad                      # gather
                            + 2 * nemb * e_pad * n_pad                    # scatter
                            + 2 * (4 * nemb) * nemb * n_pad               # packed Wroot|Wh
                            + 2 * (3 * nemb) * nemb * n_pad)              # Wi
        + 2 * nemb * n_pad * g_pad)                                       # pool
    transcendentals = int(num_conv_steps * 3 * nemb * n_pad)
    bytes_accessed = int(sum(x.size * 4 for x in inputs) + nemb * g_pad * 4)

    out_t = pl.pallas_call(
        functools.partial(state_embed_kernel, nemb=nemb, n_nodes=N,
                          num_conv_steps=num_conv_steps),
        out_shape=jax.ShapeDtypeStruct((nemb, g_pad), jnp.float32),
        grid=(1,),
        in_specs=[_full_spec(x.shape) for x in inputs],
        out_specs=_full_spec((nemb, g_pad)),
        compiler_params=pltpu.CompilerParams(
            dimension_semantics=("arbitrary",),
            vmem_limit_bytes=32 * 1024 * 1024),
        cost_estimate=pl.CostEstimate(flops=flops,
                                      transcendentals=transcendentals,
                                      bytes_accessed=bytes_accessed),
    )(*inputs)

    return out_t[:, :num_graphs].T                                        # (num_graphs, nemb)


# ----------------------------------------------------------------------------
# Parameters (deterministic init; shapes follow StateEmbeddingNet, version='v1')
# GRU gate weights/biases are stored pre-packed as [r | z | n] slabs.
# ----------------------------------------------------------------------------
def init_params(key, nemb, nvec, num_true_blocks, num_stem_types):
    ks = jax.random.split(key, 12)
    it = iter(range(12))

    def w(shape, scale=0.1):
        return jax.random.normal(ks[next(it)], shape, jnp.float32) * scale

    p = {}
    p['blockemb'] = w((num_true_blocks + 1, nemb))
    # stememb exists in the module but is unused by forward(); omitted here.
    p['bondemb'] = w((num_stem_types, nemb))
    p['b2e_w1'] = w((nemb + nvec, nemb)); p['b2e_b1'] = w((1, nemb))
    p['b2e_w2'] = w((nemb, nemb));        p['b2e_b2'] = w((1, nemb))
    p['conv_wroot'] = w((nemb, nemb));    p['conv_b'] = w((1, nemb))
    p['gru_wi'] = w((nemb, 3 * nemb));    p['gru_bi'] = w((1, 3 * nemb))
    p['gru_wh'] = w((nemb, 3 * nemb));    p['gru_bh'] = w((1, 3 * nemb))
    return p


# ----------------------------------------------------------------------------
# Pure-JAX reference (independent formulation: index gather + segment_sum)
# ----------------------------------------------------------------------------
def reference_forward(params, graph, vec_data, nemb, num_conv_steps):
    def lrelu(v):
        return jnp.where(v > 0, v, 0.01 * v)

    x_emb = params['blockemb'][graph['x']]
    bond = params['bondemb'][graph['edge_attr']]
    a_e, b_e = bond[:, 0, :], bond[:, 1, :]
    out = jnp.concatenate([x_emb, vec_data[graph['batch']]], axis=1)
    out = lrelu(out @ params['b2e_w1'] + params['b2e_b1']) @ params['b2e_w2'] + params['b2e_b2']
    h = out

    src, tgt = graph['edge_index'][0], graph['edge_index'][1]
    N = x_emb.shape[0]
    deg = jax.ops.segment_sum(jnp.ones_like(tgt, jnp.float32), tgt, num_segments=N)
    for _ in range(num_conv_steps):
        msg = jnp.sum(h[src] * a_e, axis=1, keepdims=True) * b_e
        agg = jax.ops.segment_sum(msg, tgt, num_segments=N) / jnp.maximum(deg, 1.0)[:, None]
        m = lrelu(agg + h @ params['conv_wroot'] + params['conv_b'])
        gi = m @ params['gru_wi'] + params['gru_bi']
        gh = h @ params['gru_wh'] + params['gru_bh']
        r = jax.nn.sigmoid(gi[:, :nemb] + gh[:, :nemb])
        z = jax.nn.sigmoid(gi[:, nemb:2 * nemb] + gh[:, nemb:2 * nemb])
        n = jnp.tanh(gi[:, 2 * nemb:] + r * gh[:, 2 * nemb:])
        h = (1.0 - z) * n + z * h

    num_graphs = vec_data.shape[0]
    cnt = jax.ops.segment_sum(jnp.ones((N,), jnp.float32), graph['batch'], num_segments=num_graphs)
    return jax.ops.segment_sum(h, graph['batch'], num_segments=num_graphs) / jnp.maximum(cnt, 1.0)[:, None]


# ----------------------------------------------------------------------------
# main
# ----------------------------------------------------------------------------
if __name__ == "__main__":
    nemb, nvec = 32, 8
    num_conv_steps = 3
    num_true_blocks, num_stem_types = 10, 5

    key = jax.random.PRNGKey(0)
    pkey, dkey = jax.random.split(key)
    params = init_params(pkey, nemb, nvec, num_true_blocks, num_stem_types)

    # small synthetic batch of 2 graphs: 4 + 2 nodes, 8 directed edges
    dks = jax.random.split(dkey, 3)
    N, E, num_graphs = 6, 8, 2
    graph = dict(
        x=jax.random.randint(dks[0], (N,), 0, num_true_blocks + 1, dtype=jnp.int32),
        edge_attr=jax.random.randint(dks[1], (E, 2), 0, num_stem_types, dtype=jnp.int32),
        edge_index=jnp.array([[0, 1, 2, 3, 0, 2, 4, 5],
                              [1, 0, 3, 2, 2, 0, 5, 4]], dtype=jnp.int32),
        batch=jnp.array([0, 0, 0, 0, 1, 1], dtype=jnp.int32),
    )
    vec_data = jax.random.normal(dks[2], (num_graphs, nvec), jnp.float32)

    state_embedding = state_embedding_forward(params, graph, vec_data, nemb, num_conv_steps)
    jax.block_until_ready(state_embedding)

    assert state_embedding.shape == (num_graphs, nemb)
    assert state_embedding.dtype == jnp.float32
    ref = reference_forward(params, graph, vec_data, nemb, num_conv_steps)
    assert bool(jnp.all(jnp.isfinite(state_embedding)))
    assert bool(jnp.allclose(state_embedding, ref, atol=1e-4, rtol=1e-4))
    print("KERNEL_OK")
</pallas_src>

<mosaic_0001>
module attributes {stable_mosaic.version = 11 : i64} {
  func.func @state_embed_kernel(%arg0: i32, %arg1: memref<40x128xf32, #tpu.memory_space<vmem>>, %arg2: memref<128x128xf32, #tpu.memory_space<vmem>>, %arg3: memref<32x128xf32, #tpu.memory_space<vmem>>, %arg4: memref<32x128xf32, #tpu.memory_space<vmem>>, %arg5: memref<128x128xf32, #tpu.memory_space<vmem>>, %arg6: memref<128x128xf32, #tpu.memory_space<vmem>>, %arg7: memref<32x40xf32, #tpu.memory_space<vmem>>, %arg8: memref<32x1xf32, #tpu.memory_space<vmem>>, %arg9: memref<32x32xf32, #tpu.memory_space<vmem>>, %arg10: memref<32x1xf32, #tpu.memory_space<vmem>>, %arg11: memref<128x32xf32, #tpu.memory_space<vmem>>, %arg12: memref<32x1xf32, #tpu.memory_space<vmem>>, %arg13: memref<96x32xf32, #tpu.memory_space<vmem>>, %arg14: memref<96x1xf32, #tpu.memory_space<vmem>>, %arg15: memref<96x1xf32, #tpu.memory_space<vmem>>, %arg16: memref<32x128xf32, #tpu.memory_space<vmem>>) attributes {dimension_semantics = [#tpu.dimension_semantics<arbitrary>], iteration_bounds = array<i64: 1>, scalar_prefetch = 0 : i64, scratch_operands = 0 : i64, tpu.core_type = #tpu.core_type<tc>, window_params = [{pipeline_mode = #tpu.pipeline_mode<synchronous>, transform_indices = @transform_0, window_bounds = array<i64: 40, 128>}, {pipeline_mode = #tpu.pipeline_mode<synchronous>, transform_indices = @transform_1, window_bounds = array<i64: 128, 128>}, {pipeline_mode = #tpu.pipeline_mode<synchronous>, transform_indices = @transform_2, window_bounds = array<i64: 32, 128>}, {pipeline_mode = #tpu.pipeline_mode<synchronous>, transform_indices = @transform_3, window_bounds = array<i64: 32, 128>}, {pipeline_mode = #tpu.pipeline_mode<synchronous>, transform_indices = @transform_4, window_bounds = array<i64: 128, 128>}, {pipeline_mode = #tpu.pipeline_mode<synchronous>, transform_indices = @transform_5, window_bounds = array<i64: 128, 128>}, {pipeline_mode = #tpu.pipeline_mode<synchronous>, transform_indices = @transform_6, window_bounds = array<i64: 32, 40>}, {pipeline_mode = #tpu.pipeline_mode<synchronous>, transform_indices = @transform_7, window_bounds = array<i64: 32, 1>}, {pipeline_mode = #tpu.pipeline_mode<synchronous>, transform_indices = @transform_8, window_bounds = array<i64: 32, 32>}, {pipeline_mode = #tpu.pipeline_mode<synchronous>, transform_indices = @transform_9, window_bounds = array<i64: 32, 1>}, {pipeline_mode = #tpu.pipeline_mode<synchronous>, transform_indices = @transform_10, window_bounds = array<i64: 128, 32>}, {pipeline_mode = #tpu.pipeline_mode<synchronous>, transform_indices = @transform_11, window_bounds = array<i64: 32, 1>}, {pipeline_mode = #tpu.pipeline_mode<synchronous>, transform_indices = @transform_12, window_bounds = array<i64: 96, 32>}, {pipeline_mode = #tpu.pipeline_mode<synchronous>, transform_indices = @transform_13, window_bounds = array<i64: 96, 1>}, {pipeline_mode = #tpu.pipeline_mode<synchronous>, transform_indices = @transform_14, window_bounds = array<i64: 96, 1>}, {pipeline_mode = #tpu.pipeline_mode<synchronous>, transform_indices = @transform_15, window_bounds = array<i64: 32, 128>}]} {
    %c0 = arith.constant 0 : index
    %c0_0 = arith.constant 0 : index
    %0 = vector.load %arg1[%c0, %c0_0] : memref<40x128xf32, #tpu.memory_space<vmem>>, vector<40x128xf32>
    %c0_1 = arith.constant 0 : index
    %c0_2 = arith.constant 0 : index
    %1 = vector.load %arg7[%c0_1, %c0_2] : memref<32x40xf32, #tpu.memory_space<vmem>>, vector<32x40xf32>
    %cst = arith.constant dense<0.000000e+00> : vector<32x128xf32>
    %2 = tpu.matmul %1, %0, %cst {dimension_numbers = #tpu.dot_dimension_numbers<[1], [0], [0], [1], [0, 0, 1, 1], [], []>} : vector<32x40xf32>, vector<40x128xf32>, vector<32x128xf32> -> vector<32x128xf32>
    %c0_3 = arith.constant 0 : index
    %c0_4 = arith.constant 0 : index
    %3 = vector.load %arg8[%c0_3, %c0_4] : memref<32x1xf32, #tpu.memory_space<vmem>>, vector<32x1xf32>
    %4 = vector.broadcast %3 : vector<32x1xf32> to vector<32x128xf32>
    %5 = arith.addf %2, %4 : vector<32x128xf32>
    %cst_5 = arith.constant 0.000000e+00 : f32
    %6 = vector.broadcast %cst_5 : f32 to vector<32x128xf32>
    %7 = arith.cmpf ogt, %5, %6 : vector<32x128xf32>
    %cst_6 = arith.constant 0.00999999977 : f32
    %8 = vector.broadcast %cst_6 : f32 to vector<32x128xf32>
    %9 = arith.mulf %8, %5 : vector<32x128xf32>
    %10 = arith.select %7, %5, %9 : vector<32x128xi1>, vector<32x128xf32>
    %c0_7 = arith.constant 0 : index
    %c0_8 = arith.constant 0 : index
    %11 = vector.load %arg9[%c0_7, %c0_8] : memref<32x32xf32, #tpu.memory_space<vmem>>, vector<32x32xf32>
    %cst_9 = arith.constant dense<0.000000e+00> : vector<32x128xf32>
    %12 = tpu.matmul %11, %10, %cst_9 {dimension_numbers = #tpu.dot_dimension_numbers<[1], [0], [0], [1], [0, 0, 1, 1], [], []>} : vector<32x32xf32>, vector<32x128xf32>, vector<32x128xf32> -> vector<32x128xf32>
    %c0_10 = arith.constant 0 : index
    %c0_11 = arith.constant 0 : index
    %13 = vector.load %arg10[%c0_10, %c0_11] : memref<32x1xf32, #tpu.memory_space<vmem>>, vector<32x1xf32>
    %14 = vector.broadcast %13 : vector<32x1xf32> to vector<32x128xf32>
    %15 = arith.addf %12, %14 : vector<32x128xf32>
    %16 = tpu.iota {dimensions = array<i32: 1>} : vector<1x128xi32>
    %c6_i32 = arith.constant 6 : i32
    %17 = vector.broadcast %c6_i32 : i32 to vector<1x128xi32>
    %18 = arith.cmpi slt, %16, %17 : vector<1x128xi32>
    %19 = arith.extui %18 : vector<1x128xi1> to vector<1x128xi32>
    %20 = arith.sitofp %19 : vector<1x128xi32> to vector<1x128xf32>
    %21 = vector.broadcast %20 : vector<1x128xf32> to vector<32x128xf32>
    %22 = arith.mulf %15, %21 : vector<32x128xf32>
    %c0_12 = arith.constant 0 : index
    %c0_13 = arith.constant 0 : index
    %23 = vector.load %arg2[%c0_12, %c0_13] : memref<128x128xf32, #tpu.memory_space<vmem>>, vector<128x128xf32>
    %c0_14 = arith.constant 0 : index
    %c0_15 = arith.constant 0 : index
    %24 = vector.load %arg5[%c0_14, %c0_15] : memref<128x128xf32, #tpu.memory_space<vmem>>, vector<128x128xf32>
    %c0_16 = arith.constant 0 : index
    %c0_17 = arith.constant 0 : index
    %25 = vector.load %arg3[%c0_16, %c0_17] : memref<32x128xf32, #tpu.memory_space<vmem>>, vector<32x128xf32>
    %c0_18 = arith.constant 0 : index
    %c0_19 = arith.constant 0 : index
    %26 = vector.load %arg4[%c0_18, %c0_19] : memref<32x128xf32, #tpu.memory_space<vmem>>, vector<32x128xf32>
    %c0_20 = arith.constant 0 : index
    %c0_21 = arith.constant 0 : index
    %27 = vector.load %arg11[%c0_20, %c0_21] : memref<128x32xf32, #tpu.memory_space<vmem>>, vector<128x32xf32>
    %c0_22 = arith.constant 0 : index
    %c0_23 = arith.constant 0 : index
    %28 = vector.load %arg13[%c0_22, %c0_23] : memref<96x32xf32, #tpu.memory_space<vmem>>, vector<96x32xf32>
    %c0_24 = arith.constant 0 : index
    %c0_25 = arith.constant 0 : index
    %29 = vector.load %arg12[%c0_24, %c0_25] : memref<32x1xf32, #tpu.memory_space<vmem>>, vector<32x1xf32>
    %c0_26 = arith.constant 0 : index
    %c0_27 = arith.constant 0 : index
    %30 = vector.load %arg14[%c0_26, %c0_27] : memref<96x1xf32, #tpu.memory_space<vmem>>, vector<96x1xf32>
    %c0_28 = arith.constant 0 : index
    %c0_29 = arith.constant 0 : index
    %31 = vector.load %arg15[%c0_28, %c0_29] : memref<96x1xf32, #tpu.memory_space<vmem>>, vector<96x1xf32>
    %c0_i32 = arith.constant 0 : i32
    %cst_30 = arith.constant dense<0.000000e+00> : vector<32x128xf32>
    %32 = tpu.matmul %22, %23, %cst_30 {dimension_numbers = #tpu.dot_dimension_numbers<[1], [0], [0], [1], [0, 0, 1, 1], [], []>} : vector<32x128xf32>, vector<128x128xf32>, vector<32x128xf32> -> vector<32x128xf32>
    %33 = arith.mulf %32, %25 : vector<32x128xf32>
    %cst_31 = arith.constant dense<0.000000e+00> : vector<128xf32>
    %34 = vector.multi_reduction <add>, %33, %cst_31 [0] : vector<32x128xf32> to vector<128xf32>
    %35 = vector.shape_cast %34 : vector<128xf32> to vector<1x128xf32>
    %36 = vector.broadcast %35 : vector<1x128xf32> to vector<32x128xf32>
    %37 = arith.mulf %36, %26 : vector<32x128xf32>
    %cst_32 = arith.constant dense<0.000000e+00> : vector<128x128xf32>
    %38 = tpu.matmul %27, %22, %cst_32 {dimension_numbers = #tpu.dot_dimension_numbers<[1], [0], [0], [1], [0, 0, 1, 1], [], []>} : vector<128x32xf32>, vector<32x128xf32>, vector<128x128xf32> -> vector<128x128xf32>
    %cst_33 = arith.constant dense<0.000000e+00> : vector<32x128xf32>
    %39 = tpu.matmul %37, %24, %cst_33 {dimension_numbers = #tpu.dot_dimension_numbers<[1], [0], [0], [1], [0, 0, 1, 1], [], []>} : vector<32x128xf32>, vector<128x128xf32>, vector<32x128xf32> -> vector<32x128xf32>
    %40 = vector.extract_strided_slice %38 {offsets = [0, 0], sizes = [32, 128], strides = [1, 1]} : vector<128x128xf32> to vector<32x128xf32>
    %41 = arith.addf %39, %40 : vector<32x128xf32>
    %42 = vector.broadcast %29 : vector<32x1xf32> to vector<32x128xf32>
    %43 = arith.addf %41, %42 : vector<32x128xf32>
    %cst_34 = arith.constant 0.000000e+00 : f32
    %44 = vector.broadcast %cst_34 : f32 to vector<32x128xf32>
    %45 = arith.cmpf ogt, %43, %44 : vector<32x128xf32>
    %cst_35 = arith.constant 0.00999999977 : f32
    %46 = vector.broadcast %cst_35 : f32 to vector<32x128xf32>
    %47 = arith.mulf %46, %43 : vector<32x128xf32>
    %48 = arith.select %45, %43, %47 : vector<32x128xi1>, vector<32x128xf32>
    %cst_36 = arith.constant dense<0.000000e+00> : vector<96x128xf32>
    %49 = tpu.matmul %28, %48, %cst_36 {dimension_numbers = #tpu.dot_dimension_numbers<[1], [0], [0], [1], [0, 0, 1, 1], [], []>} : vector<96x32xf32>, vector<32x128xf32>, vector<96x128xf32> -> vector<96x128xf32>
    %50 = vector.broadcast %30 : vector<96x1xf32> to vector<96x128xf32>
    %51 = arith.addf %49, %50 : vector<96x128xf32>
    %52 = vector.extract_strided_slice %38 {offsets = [32, 0], sizes = [96, 128], strides = [1, 1]} : vector<128x128xf32> to vector<96x128xf32>
    %53 = vector.broadcast %31 : vector<96x1xf32> to vector<96x128xf32>
    %54 = arith.addf %52, %53 : vector<96x128xf32>
    %55 = vector.extract_strided_slice %51 {offsets = [0, 0], sizes = [32, 128], strides = [1, 1]} : vector<96x128xf32> to vector<32x128xf32>
    %56 = vector.extract_strided_slice %54 {offsets = [0, 0], sizes = [32, 128], strides = [1, 1]} : vector<96x128xf32> to vector<32x128xf32>
    %57 = arith.addf %55, %56 : vector<32x128xf32>
    %58 = arith.negf %57 : vector<32x128xf32>
    %59 = math.exp %58 : vector<32x128xf32>
    %cst_37 = arith.constant 1.000000e+00 : f32
    %60 = vector.broadcast %cst_37 : f32 to vector<32x128xf32>
    %61 = arith.addf %60, %59 : vector<32x128xf32>
    %62 = arith.divf %60, %61 : vector<32x128xf32>
    %63 = vector.extract_strided_slice %51 {offsets = [32, 0], sizes = [32, 128], strides = [1, 1]} : vector<96x128xf32> to vector<32x128xf32>
    %64 = vector.extract_strided_slice %54 {offsets = [32, 0], sizes = [32, 128], strides = [1, 1]} : vector<96x128xf32> to vector<32x128xf32>
    %65 = arith.addf %63, %64 : vector<32x128xf32>
    %66 = arith.negf %65 : vector<32x128xf32>
    %67 = math.exp %66 : vector<32x128xf32>
    %cst_38 = arith.constant 1.000000e+00 : f32
    %68 = vector.broadcast %cst_38 : f32 to vector<32x128xf32>
    %69 = arith.addf %68, %67 : vector<32x128xf32>
    %70 = arith.divf %68, %69 : vector<32x128xf32>
    %71 = vector.extract_strided_slice %51 {offsets = [64, 0], sizes = [32, 128], strides = [1, 1]} : vector<96x128xf32> to vector<32x128xf32>
    %72 = vector.extract_strided_slice %54 {offsets = [64, 0], sizes = [32, 128], strides = [1, 1]} : vector<96x128xf32> to vector<32x128xf32>
    %73 = arith.mulf %62, %72 : vector<32x128xf32>
    %74 = arith.addf %71, %73 : vector<32x128xf32>
    %75 = math.tanh %74 : vector<32x128xf32>
    %cst_39 = arith.constant 1.000000e+00 : f32
    %76 = vector.broadcast %cst_39 : f32 to vector<32x128xf32>
    %77 = arith.subf %76, %70 : vector<32x128xf32>
    %78 = arith.mulf %77, %75 : vector<32x128xf32>
    %79 = arith.mulf %70, %22 : vector<32x128xf32>
    %80 = arith.addf %78, %79 : vector<32x128xf32>
    %81 = vector.broadcast %20 : vector<1x128xf32> to vector<32x128xf32>
    %82 = arith.mulf %80, %81 : vector<32x128xf32>
    %c1_i32 = arith.constant 1 : i32
    %cst_40 = arith.constant dense<0.000000e+00> : vector<32x128xf32>
    %83 = tpu.matmul %82, %23, %cst_40 {dimension_numbers = #tpu.dot_dimension_numbers<[1], [0], [0], [1], [0, 0, 1, 1], [], []>} : vector<32x128xf32>, vector<128x128xf32>, vector<32x128xf32> -> vector<32x128xf32>
    %84 = arith.mulf %83, %25 : vector<32x128xf32>
    %cst_41 = arith.constant dense<0.000000e+00> : vector<128xf32>
    %85 = vector.multi_reduction <add>, %84, %cst_41 [0] : vector<32x128xf32> to vector<128xf32>
    %86 = vector.shape_cast %85 : vector<128xf32> to vector<1x128xf32>
    %87 = vector.broadcast %86 : vector<1x128xf32> to vector<32x128xf32>
    %88 = arith.mulf %87, %26 : vector<32x128xf32>
    %cst_42 = arith.constant dense<0.000000e+00> : vector<128x128xf32>
    %89 = tpu.matmul %27, %82, %cst_42 {dimension_numbers = #tpu.dot_dimension_numbers<[1], [0], [0], [1], [0, 0, 1, 1], [], []>} : vector<128x32xf32>, vector<32x128xf32>, vector<128x128xf32> -> vector<128x128xf32>
    %cst_43 = arith.constant dense<0.000000e+00> : vector<32x128xf32>
    %90 = tpu.matmul %88, %24, %cst_43 {dimension_numbers = #tpu.dot_dimension_numbers<[1], [0], [0], [1], [0, 0, 1, 1], [], []>} : vector<32x128xf32>, vector<128x128xf32>, vector<32x128xf32> -> vector<32x128xf32>
    %91 = vector.extract_strided_slice %89 {offsets = [0, 0], sizes = [32, 128], strides = [1, 1]} : vector<128x128xf32> to vector<32x128xf32>
    %92 = arith.addf %90, %91 : vector<32x128xf32>
    %93 = vector.broadcast %29 : vector<32x1xf32> to vector<32x128xf32>
    %94 = arith.addf %92, %93 : vector<32x128xf32>
    %cst_44 = arith.constant 0.000000e+00 : f32
    %95 = vector.broadcast %cst_44 : f32 to vector<32x128xf32>
    %96 = arith.cmpf ogt, %94, %95 : vector<32x128xf32>
    %cst_45 = arith.constant 0.00999999977 : f32
    %97 = vector.broadcast %cst_45 : f32 to vector<32x128xf32>
    %98 = arith.mulf %97, %94 : vector<32x128xf32>
    %99 = arith.select %96, %94, %98 : vector<32x128xi1>, vector<32x128xf32>
    %cst_46 = arith.constant dense<0.000000e+00> : vector<96x128xf32>
    %100 = tpu.matmul %28, %99, %cst_46 {dimension_numbers = #tpu.dot_dimension_numbers<[1], [0], [0], [1], [0, 0, 1, 1], [], []>} : vector<96x32xf32>, vector<32x128xf32>, vector<96x128xf32> -> vector<96x128xf32>
    %101 = vector.broadcast %30 : vector<96x1xf32> to vector<96x128xf32>
    %102 = arith.addf %100, %101 : vector<96x128xf32>
    %103 = vector.extract_strided_slice %89 {offsets = [32, 0], sizes = [96, 128], strides = [1, 1]} : vector<128x128xf32> to vector<96x128xf32>
    %104 = vector.broadcast %31 : vector<96x1xf32> to vector<96x128xf32>
    %105 = arith.addf %103, %104 : vector<96x128xf32>
    %106 = vector.extract_strided_slice %102 {offsets = [0, 0], sizes = [32, 128], strides = [1, 1]} : vector<96x128xf32> to vector<32x128xf32>
    %107 = vector.extract_strided_slice %105 {offsets = [0, 0], sizes = [32, 128], strides = [1, 1]} : vector<96x128xf32> to vector<32x128xf32>
    %108 = arith.addf %106, %107 : vector<32x128xf32>
    %109 = arith.negf %108 : vector<32x128xf32>
    %110 = math.exp %109 : vector<32x128xf32>
    %cst_47 = arith.constant 1.000000e+00 : f32
    %111 = vector.broadcast %cst_47 : f32 to vector<32x128xf32>
    %112 = arith.addf %111, %110 : vector<32x128xf32>
    %113 = arith.divf %111, %112 : vector<32x128xf32>
    %114 = vector.extract_strided_slice %102 {offsets = [32, 0], sizes = [32, 128], strides = [1, 1]} : vector<96x128xf32> to vector<32x128xf32>
    %115 = vector.extract_strided_slice %105 {offsets = [32, 0], sizes = [32, 128], strides = [1, 1]} : vector<96x128xf32> to vector<32x128xf32>
    %116 = arith.addf %114, %115 : vector<32x128xf32>
    %117 = arith.negf %116 : vector<32x128xf32>
    %118 = math.exp %117 : vector<32x128xf32>
    %cst_48 = arith.constant 1.000000e+00 : f32
    %119 = vector.broadcast %cst_48 : f32 to vector<32x128xf32>
    %120 = arith.addf %119, %118 : vector<32x128xf32>
    %121 = arith.divf %119, %120 : vector<32x128xf32>
    %122 = vector.extract_strided_slice %102 {offsets = [64, 0], sizes = [32, 128], strides = [1, 1]} : vector<96x128xf32> to vector<32x128xf32>
    %123 = vector.extract_strided_slice %105 {offsets = [64, 0], sizes = [32, 128], strides = [1, 1]} : vector<96x128xf32> to vector<32x128xf32>
    %124 = arith.mulf %113, %123 : vector<32x128xf32>
    %125 = arith.addf %122, %124 : vector<32x128xf32>
    %126 = math.tanh %125 : vector<32x128xf32>
    %cst_49 = arith.constant 1.000000e+00 : f32
    %127 = vector.broadcast %cst_49 : f32 to vector<32x128xf32>
    %128 = arith.subf %127, %121 : vector<32x128xf32>
    %129 = arith.mulf %128, %126 : vector<32x128xf32>
    %130 = arith.mulf %121, %82 : vector<32x128xf32>
    %131 = arith.addf %129, %130 : vector<32x128xf32>
    %132 = vector.broadcast %20 : vector<1x128xf32> to vector<32x128xf32>
    %133 = arith.mulf %131, %132 : vector<32x128xf32>
    %c2_i32 = arith.constant 2 : i32
    %cst_50 = arith.constant dense<0.000000e+00> : vector<32x128xf32>
    %134 = tpu.matmul %133, %23, %cst_50 {dimension_numbers = #tpu.dot_dimension_numbers<[1], [0], [0], [1], [0, 0, 1, 1], [], []>} : vector<32x128xf32>, vector<128x128xf32>, vector<32x128xf32> -> vector<32x128xf32>
    %135 = arith.mulf %134, %25 : vector<32x128xf32>
    %cst_51 = arith.constant dense<0.000000e+00> : vector<128xf32>
    %136 = vector.multi_reduction <add>, %135, %cst_51 [0] : vector<32x128xf32> to vector<128xf32>
    %137 = vector.shape_cast %136 : vector<128xf32> to vector<1x128xf32>
    %138 = vector.broadcast %137 : vector<1x128xf32> to vector<32x128xf32>
    %139 = arith.mulf %138, %26 : vector<32x128xf32>
    %cst_52 = arith.constant dense<0.000000e+00> : vector<128x128xf32>
    %140 = tpu.matmul %27, %133, %cst_52 {dimension_numbers = #tpu.dot_dimension_numbers<[1], [0], [0], [1], [0, 0, 1, 1], [], []>} : vector<128x32xf32>, vector<32x128xf32>, vector<128x128xf32> -> vector<128x128xf32>
    %cst_53 = arith.constant dense<0.000000e+00> : vector<32x128xf32>
    %141 = tpu.matmul %139, %24, %cst_53 {dimension_numbers = #tpu.dot_dimension_numbers<[1], [0], [0], [1], [0, 0, 1, 1], [], []>} : vector<32x128xf32>, vector<128x128xf32>, vector<32x128xf32> -> vector<32x128xf32>
    %142 = vector.extract_strided_slice %140 {offsets = [0, 0], sizes = [32, 128], strides = [1, 1]} : vector<128x128xf32> to vector<32x128xf32>
    %143 = arith.addf %141, %142 : vector<32x128xf32>
    %144 = vector.broadcast %29 : vector<32x1xf32> to vector<32x128xf32>
    %145 = arith.addf %143, %144 : vector<32x128xf32>
    %cst_54 = arith.constant 0.000000e+00 : f32
    %146 = vector.broadcast %cst_54 : f32 to vector<32x128xf32>
    %147 = arith.cmpf ogt, %145, %146 : vector<32x128xf32>
    %cst_55 = arith.constant 0.00999999977 : f32
    %148 = vector.broadcast %cst_55 : f32 to vector<32x128xf32>
    %149 = arith.mulf %148, %145 : vector<32x128xf32>
    %150 = arith.select %147, %145, %149 : vector<32x128xi1>, vector<32x128xf32>
    %cst_56 = arith.constant dense<0.000000e+00> : vector<96x128xf32>
    %151 = tpu.matmul %28, %150, %cst_56 {dimension_numbers = #tpu.dot_dimension_numbers<[1], [0], [0], [1], [0, 0, 1, 1], [], []>} : vector<96x32xf32>, vector<32x128xf32>, vector<96x128xf32> -> vector<96x128xf32>
    %152 = vector.broadcast %30 : vector<96x1xf32> to vector<96x128xf32>
    %153 = arith.addf %151, %152 : vector<96x128xf32>
    %154 = vector.extract_strided_slice %140 {offsets = [32, 0], sizes = [96, 128], strides = [1, 1]} : vector<128x128xf32> to vector<96x128xf32>
    %155 = vector.broadcast %31 : vector<96x1xf32> to vector<96x128xf32>
    %156 = arith.addf %154, %155 : vector<96x128xf32>
    %157 = vector.extract_strided_slice %153 {offsets = [0, 0], sizes = [32, 128], strides = [1, 1]} : vector<96x128xf32> to vector<32x128xf32>
    %158 = vector.extract_strided_slice %156 {offsets = [0, 0], sizes = [32, 128], strides = [1, 1]} : vector<96x128xf32> to vector<32x128xf32>
    %159 = arith.addf %157, %158 : vector<32x128xf32>
    %160 = arith.negf %159 : vector<32x128xf32>
    %161 = math.exp %160 : vector<32x128xf32>
    %cst_57 = arith.constant 1.000000e+00 : f32
    %162 = vector.broadcast %cst_57 : f32 to vector<32x128xf32>
    %163 = arith.addf %162, %161 : vector<32x128xf32>
    %164 = arith.divf %162, %163 : vector<32x128xf32>
    %165 = vector.extract_strided_slice %153 {offsets = [32, 0], sizes = [32, 128], strides = [1, 1]} : vector<96x128xf32> to vector<32x128xf32>
    %166 = vector.extract_strided_slice %156 {offsets = [32, 0], sizes = [32, 128], strides = [1, 1]} : vector<96x128xf32> to vector<32x128xf32>
    %167 = arith.addf %165, %166 : vector<32x128xf32>
    %168 = arith.negf %167 : vector<32x128xf32>
    %169 = math.exp %168 : vector<32x128xf32>
    %cst_58 = arith.constant 1.000000e+00 : f32
    %170 = vector.broadcast %cst_58 : f32 to vector<32x128xf32>
    %171 = arith.addf %170, %169 : vector<32x128xf32>
    %172 = arith.divf %170, %171 : vector<32x128xf32>
    %173 = vector.extract_strided_slice %153 {offsets = [64, 0], sizes = [32, 128], strides = [1, 1]} : vector<96x128xf32> to vector<32x128xf32>
    %174 = vector.extract_strided_slice %156 {offsets = [64, 0], sizes = [32, 128], strides = [1, 1]} : vector<96x128xf32> to vector<32x128xf32>
    %175 = arith.mulf %164, %174 : vector<32x128xf32>
    %176 = arith.addf %173, %175 : vector<32x128xf32>
    %177 = math.tanh %176 : vector<32x128xf32>
    %cst_59 = arith.constant 1.000000e+00 : f32
    %178 = vector.broadcast %cst_59 : f32 to vector<32x128xf32>
    %179 = arith.subf %178, %172 : vector<32x128xf32>
    %180 = arith.mulf %179, %177 : vector<32x128xf32>
    %181 = arith.mulf %172, %133 : vector<32x128xf32>
    %182 = arith.addf %180, %181 : vector<32x128xf32>
    %183 = vector.broadcast %20 : vector<1x128xf32> to vector<32x128xf32>
    %184 = arith.mulf %182, %183 : vector<32x128xf32>
    %c0_60 = arith.constant 0 : index
    %c0_61 = arith.constant 0 : index
    %185 = vector.load %arg6[%c0_60, %c0_61] : memref<128x128xf32, #tpu.memory_space<vmem>>, vector<128x128xf32>
    %cst_62 = arith.constant dense<0.000000e+00> : vector<32x128xf32>
    %186 = tpu.matmul %184, %185, %cst_62 {dimension_numbers = #tpu.dot_dimension_numbers<[1], [0], [0], [1], [0, 0, 1, 1], [], []>} : vector<32x128xf32>, vector<128x128xf32>, vector<32x128xf32> -> vector<32x128xf32>
    %c0_63 = arith.constant 0 : index
    %c0_64 = arith.constant 0 : index
    %187 = vector.load %arg16[%c0_63, %c0_64] : memref<32x128xf32, #tpu.memory_space<vmem>>, vector<32x128xf32>
    tpu.vector_store %arg16[%c0_63, %c0_64], %186 {strides = array<i32>} : memref<32x128xf32, #tpu.memory_space<vmem>>, vector<32x128xf32>,
    return
  }
  func.func @transform_0(%arg0: i32) -> (i32, i32) {
    %c0_i32 = arith.constant 0 : i32
    %c0_i32_0 = arith.constant 0 : i32
    %c0_i32_1 = arith.constant 0 : i32
    return %c0_i32, %c0_i32_0 : i32, i32
  }
  func.func @transform_1(%arg0: i32) -> (i32, i32) {
    %c0_i32 = arith.constant 0 : i32
    %c0_i32_0 = arith.constant 0 : i32
    %c0_i32_1 = arith.constant 0 : i32
    return %c0_i32, %c0_i32_0 : i32, i32
  }
  func.func @transform_2(%arg0: i32) -> (i32, i32) {
    %c0_i32 = arith.constant 0 : i32
    %c0_i32_0 = arith.constant 0 : i32
    %c0_i32_1 = arith.constant 0 : i32
    return %c0_i32, %c0_i32_0 : i32, i32
  }
  func.func @transform_3(%arg0: i32) -> (i32, i32) {
    %c0_i32 = arith.constant 0 : i32
    %c0_i32_0 = arith.constant 0 : i32
    %c0_i32_1 = arith.constant 0 : i32
    return %c0_i32, %c0_i32_0 : i32, i32
  }
  func.func @transform_4(%arg0: i32) -> (i32, i32) {
    %c0_i32 = arith.constant 0 : i32
    %c0_i32_0 = arith.constant 0 : i32
    %c0_i32_1 = arith.constant 0 : i32
    return %c0_i32, %c0_i32_0 : i32, i32
  }
  func.func @transform_5(%arg0: i32) -> (i32, i32) {
    %c0_i32 = arith.constant 0 : i32
    %c0_i32_0 = arith.constant 0 : i32
    %c0_i32_1 = arith.constant 0 : i32
    return %c0_i32, %c0_i32_0 : i32, i32
  }
  func.func @transform_6(%arg0: i32) -> (i32, i32) {
    %c0_i32 = arith.constant 0 : i32
    %c0_i32_0 = arith.constant 0 : i32
    %c0_i32_1 = arith.constant 0 : i32
    return %c0_i32, %c0_i32_0 : i32, i32
  }
  func.func @transform_7(%arg0: i32) -> (i32, i32) {
    %c0_i32 = arith.constant 0 : i32
    %c0_i32_0 = arith.constant 0 : i32
    %c0_i32_1 = arith.constant 0 : i32
    return %c0_i32, %c0_i32_0 : i32, i32
  }
  func.func @transform_8(%arg0: i32) -> (i32, i32) {
    %c0_i32 = arith.constant 0 : i32
    %c0_i32_0 = arith.constant 0 : i32
    %c0_i32_1 = arith.constant 0 : i32
    return %c0_i32, %c0_i32_0 : i32, i32
  }
  func.func @transform_9(%arg0: i32) -> (i32, i32) {
    %c0_i32 = arith.constant 0 : i32
    %c0_i32_0 = arith.constant 0 : i32
    %c0_i32_1 = arith.constant 0 : i32
    return %c0_i32, %c0_i32_0 : i32, i32
  }
  func.func @transform_10(%arg0: i32) -> (i32, i32) {
    %c0_i32 = arith.constant 0 : i32
    %c0_i32_0 = arith.constant 0 : i32
    %c0_i32_1 = arith.constant 0 : i32
    return %c0_i32, %c0_i32_0 : i32, i32
  }
  func.func @transform_11(%arg0: i32) -> (i32, i32) {
    %c0_i32 = arith.constant 0 : i32
    %c0_i32_0 = arith.constant 0 : i32
    %c0_i32_1 = arith.constant 0 : i32
    return %c0_i32, %c0_i32_0 : i32, i32
  }
  func.func @transform_12(%arg0: i32) -> (i32, i32) {
    %c0_i32 = arith.constant 0 : i32
    %c0_i32_0 = arith.constant 0 : i32
    %c0_i32_1 = arith.constant 0 : i32
    return %c0_i32, %c0_i32_0 : i32, i32
  }
  func.func @transform_13(%arg0: i32) -> (i32, i32) {
    %c0_i32 = arith.constant 0 : i32
    %c0_i32_0 = arith.constant 0 : i32
    %c0_i32_1 = arith.constant 0 : i32
    return %c0_i32, %c0_i32_0 : i32, i32
  }
  func.func @transform_14(%arg0: i32) -> (i32, i32) {
    %c0_i32 = arith.constant 0 : i32
    %c0_i32_0 = arith.constant 0 : i32
    %c0_i32_1 = arith.constant 0 : i32
    return %c0_i32, %c0_i32_0 : i32, i32
  }
  func.func @transform_15(%arg0: i32) -> (i32, i32) {
    %c0_i32 = arith.constant 0 : i32
    %c0_i32_0 = arith.constant 0 : i32
    %c0_i32_1 = arith.constant 0 : i32
    return %c0_i32, %c0_i32_0 : i32, i32
  }
}

</mosaic_0001>

<bundles_post_ra>
// kernel: tpu_custom_call.1
= control target key start
LH: loop header
LB: loop body
LE: loop exit
PB: predicated region body
PF: predicated region fallthrough
CT: control target
= control target key end

     0   :  { %v2159_v3 = vmov 0   ;;  %s3854_s0 = inlined_call_operand.vmem [shape: f32[40,128], index: 0, kind: input, shape index: {}]   ;;  %s3855_s1 = inlined_call_operand.vmem [shape: f32[128,128], index: 1, kind: input, shape index: {}]   ;;  %s3856_s2 = inlined_call_operand.vmem [shape: f32[32,128], index: 2, kind: input, shape index: {}]   ;;  %s3857_s3 = inlined_call_operand.vmem [shape: f32[32,128], index: 3, kind: input, shape index: {}]   ;;  %s3858_s4 = inlined_call_operand.vmem [shape: f32[128,128], index: 4, kind: input, shape index: {}]   ;;  %s3859_s5 = inlined_call_operand.vmem [shape: f32[128,128], index: 5, kind: input, shape index: {}]   ;;  %s3860_s6 = inlined_call_operand.vmem [shape: f32[32,40], index: 6, kind: input, shape index: {}]   ;;  %s3861_s7 = inlined_call_operand.vmem [shape: f32[32,1], index: 7, kind: input, shape index: {}]   ;;  %s3862_s8 = inlined_call_operand.vmem [shape: f32[32,32], index: 8, kind: input, shape index: {}]   ;;  %s3863_s9 = inlined_call_operand.vmem [shape: f32[32,1], index: 9, kind: input, shape index: {}]   ;;  %s3864_s10 = inlined_call_operand.vmem [shape: f32[128,32], index: 10, kind: input, shape index: {}]   ;;  %s3865_s11 = inlined_call_operand.vmem [shape: f32[32,1], index: 11, kind: input, shape index: {}]   ;;  %s3866_s12 = inlined_call_operand.vmem [shape: f32[96,32], index: 12, kind: input, shape index: {}]   ;;  %s3867_s13 = inlined_call_operand.vmem [shape: f32[96,1], index: 13, kind: input, shape index: {}]   ;;  %s3868_s14 = inlined_call_operand.vmem [shape: f32[96,1], index: 14, kind: input, shape index: {}]   ;;  %s3869_s15 = inlined_call_operand.hbm [shape: f32[32,128], index: 15, kind: output, shape index: {}]  }
   0x1   :  { %v55_v0 = vld [vmem:[%s3854_s0 + $0x20] sm:$0xff]  ;;  %v63_v1 = vld [vmem:[%s3861_s7 + $0x18] sm:$0xff]  ;;  %v61_v2 = vld [vmem:[%s3861_s7 + $0x8] sm:$0xff]  ;;  %1975 = vset.pattern.permute.xlu1 %v2159_v3  ;;  %1974 = vset.pattern.permute.xlu0 %v2159_v3 }
   0x2   :  { %v54_v4 = vld [vmem:[%s3854_s0 + $0x18] sm:$0xff]  ;;  %1960 = vmatpush.msra.mxu3 %v55_v0  ;;  %81 = vperm.xlu0 %1974, %v63_v1   ;;  %v53_v5 = vld [vmem:[%s3854_s0 + $0x10] sm:$0xff]  ;;  %v52_v6 = vld [vmem:[%s3854_s0 + $0x8] sm:$0xff] }
   0x3   :  { %71 = vperm.xlu1 %1975, %v61_v2   ;;  %108 = vmatpush.msra.mxu0 %v55_v0 }
   0x4   :  { %1961 = vmatpush.msra.mxu3 %v54_v4  ;;  %1976 = vset.pattern.permute.xlu2 %v2159_v3 }
   0x5   :  { %109 = vmatpush.msra.mxu0 %v54_v4 }
   0x6   :  { %1962 = vmatpush.msra.mxu3 %v53_v5 }
   0x7   :  { %20 = vsyncpa [#allocation3], 0  ;;  %v51_v7 = vld [vmem:[%s3854_s0] sm:$0xff]  ;;  %v62_v8 = vld [vmem:[%s3861_s7 + $0x10] sm:$0xff]  ;;  %110 = vmatpush.msra.mxu0 %v53_v5  ;;  %vm84_vm0 = vcmask 326656   ;;  %vm166_vm5 = vcmask 261120  }
   0x8   :  { %1963 = vmatpush.msra.mxu3 %v52_v6  ;;  %v60_v9 = vld [vmem:[%s3861_s7] sm:$0xff]  ;;  %v57_v10 = vld [vmem:[%s3860_s6 + $0x8] sm:$0xff]  ;;  %v144_v12 = vld [vmem:[%s3863_s9 + $0x10] sm:$0xff]  ;;  %s1831_s30 = sshll.u32 %s3869_s15, 4  ;;  %s2162_s16 = smov 128   ;;  %s1832_s30 = int_to_ptr.hbm [resolvable:$true] %s1831_s30 }
   0x9   :  { %111 = vmatpush.msra.mxu0 %v52_v6  ;;  %v56_v11 = vld [vmem:[%s3860_s6] sm:$0xff]  ;;  %v145_v13 = vld [vmem:[%s3863_s9 + $0x18] sm:$0xff]  ;;  %v58_v14 = vld [vmem:[%s3860_s6 + $0x10] sm:$0xff]  ;;  %s2163_s17 = smov 8  }
   0xa   :  { %1964 = vmatpush.msra.mxu3 %v51_v7  ;;  %76 = vperm.xlu0 %1974, %v62_v8   ;;  %v287_v15 = vld [vmem:[%s3865_s11 + $0x10] sm:$0xff]  ;;  %v286_v16 = vld [vmem:[%s3865_s11 + $0x8] sm:$0xff]  ;;  %v59_v17 = vld [vmem:[%s3860_s6 + $0x18] sm:$0xff] }
   0xb   :  { %66 = vperm.xlu1 %1975, %v60_v9   ;;  %1844 = vmatmul.msk.f32.vlgmr.msra.gmra.mxu3 %vm84_vm0, %v57_v10  ;;  %v289_v18 = vld [vmem:[%s3867_s13] sm:$0xff]  ;;  %v302_v20 = vld [vmem:[%s3868_s14 + $0x8] sm:$0xff]  ;;  %v291_v22 = vld [vmem:[%s3867_s13 + $0x10] sm:$0xff] }
   0xc   :  { %112 = vmatpush.msra.mxu0 %v51_v7  ;;  %v301_v19 = vld [vmem:[%s3868_s14] sm:$0xff]  ;;  %v303_v23 = vld [vmem:[%s3868_s14 + $0x10] sm:$0xff]  ;;  %v306_v24 = vld [vmem:[%s3868_s14 + $0x28] sm:$0xff] }
   0xd   :  { %1843 = vmatmul.msk.f32.vlgmr.msra.gmra.mxu0 %vm84_vm0, %v56_v11  ;;  %v293_v21 = vld [vmem:[%s3867_s13 + $0x20] sm:$0xff]  ;;  %v292_v25 = vld [vmem:[%s3867_s13 + $0x18] sm:$0xff]  ;;  %v295_v26 = vld [vmem:[%s3867_s13 + $0x30] sm:$0xff] }
   0xe   :  { %v307_v27 = vld [vmem:[%s3868_s14 + $0x30] sm:$0xff]  ;;  %v297_v28 = vld [vmem:[%s3867_s13 + $0x40] sm:$0xff]  ;;  %v296_v29 = vld [vmem:[%s3867_s13 + $0x38] sm:$0xff] }
   0xf   :  { %v310_v30 = vld [vmem:[%s3868_s14 + $0x48] sm:$0xff]  ;;  %v142_v32 = vld [vmem:[%s3863_s9] sm:$0xff]  ;;  %v299_v33 = vld [vmem:[%s3867_s13 + $0x50] sm:$0xff] }
  0x10   :  { %v298_v31 = vld [vmem:[%s3867_s13 + $0x48] sm:$0xff]  ;;  %148 = vperm.xlu2 %1976, %v142_v32   ;;  %v312_v34 = vld [vmem:[%s3868_s14 + $0x58] sm:$0xff]  ;;  %v285_v37 = vld [vmem:[%s3865_s11] sm:$0xff] }
  0x11   :  { %v143_v35 = vld [vmem:[%s3863_s9 + $0x8] sm:$0xff]  ;;  %v288_v36 = vld [vmem:[%s3865_s11 + $0x18] sm:$0xff]  ;;  %v305_v39 = vld [vmem:[%s3868_s14 + $0x20] sm:$0xff] }
  0x12   :  { %158 = vperm.xlu0 %1974, %v144_v12   ;;  %v290_v38 = vld [vmem:[%s3867_s13 + $0x8] sm:$0xff]  ;;  %v304_v41 = vld [vmem:[%s3868_s14 + $0x18] sm:$0xff]  ;;  %v309_v44 = vld [vmem:[%s3868_s14 + $0x40] sm:$0xff] }
  0x13   :  { %163 = vperm.xlu1 %1975, %v145_v13   ;;  %1845 = vmatmul.msk.f32.gmra.mxu3 %vm84_vm0, %v58_v14  ;;  %v294_v40 = vld [vmem:[%s3867_s13 + $0x28] sm:$0xff]  ;;  %v308_v49 = vld [vmem:[%s3868_s14 + $0x38] sm:$0xff]  ;;  %v311_v62 = vld [vmem:[%s3868_s14 + $0x50] sm:$0xff] }
  0x14   :  { %v138_v0 = vld [vmem:[%s3862_s8] sm:$0xff]  ;;  %v139_v1 = vld [vmem:[%s3862_s8 + $0x8] sm:$0xff]  ;;  %v300_v3 = vld [vmem:[%s3867_s13 + $0x58] sm:$0xff] }
  0x15   :  { %v140_v4 = vld [vmem:[%s3862_s8 + $0x10] sm:$0xff]  ;;  %v141_v5 = vld [vmem:[%s3862_s8 + $0x18] sm:$0xff]  ;;  %v2414_v8 = vld [vmem:[%s3855_s1 + $0x68] sm:$0xff] }
  0x16   :  { %v2402_v6 = vld [vmem:[%s3855_s1 + $0x78] sm:$0xff]  ;;  %v2407_v7 = vld [vmem:[%s3855_s1 + $0x70] sm:$0xff]  ;;  %v2419_v9 = vld [vmem:[%s3855_s1 + $0x60] sm:$0xff] }
  0x17   :  { %313 = vmatpush.msra.mxu2 %v2402_v6  ;;  %v2425_v10 = vld [vmem:[%s3855_s1 + $0x58] sm:$0xff]  ;;  %v2431_v11 = vld [vmem:[%s3855_s1 + $0x50] sm:$0xff]  ;;  %v2438_v12 = vld [vmem:[%s3855_s1 + $0x48] sm:$0xff] }
  0x18   :  { %153 = vperm.xlu2 %1976, %v143_v35   ;;  %v2443_v13 = vld [vmem:[%s3855_s1 + $0x40] sm:$0xff]  ;;  %v2449_v14 = vld [vmem:[%s3855_s1 + $0x38] sm:$0xff] }
  0x19   :  { %314 = vmatpush.msra.mxu2 %v2407_v7 }
  0x1a   :  { %513 = vperm.xlu0 %1974, %v287_v15   ;;  %v2455_v15 = vld [vmem:[%s3855_s1 + $0x30] sm:$0xff] }
  0x1b   :  { %508 = vperm.xlu1 %1975, %v286_v16   ;;  %1846 = vmatmul.msk.f32.gmra.mxu3 %vm84_vm0, %v59_v17  ;;  %v2462_v16 = vld [vmem:[%s3855_s1 + $0x28] sm:$0xff]  ;;  %v2467_v17 = vld [vmem:[%s3855_s1 + $0x20] sm:$0xff] }
  0x1c   :  { %315 = vmatpush.msra.mxu2 %v2414_v8 }
  0x1e   :  { %316 = vmatpush.msra.mxu2 %v2419_v9 }
  0x20   :  { %518 = vperm.xlu2 %1976, %v288_v36   ;;  %317 = vmatpush.msra.mxu2 %v2425_v10 }
  0x22   :  { %539 = vperm.xlu0 %1974, %v289_v18   ;;  %318 = vmatpush.msra.mxu2 %v2431_v11  ;;  %v2473_v18 = vld [vmem:[%s3855_s1 + $0x18] sm:$0xff] }
  0x23   :  { %688 = vperm.xlu1 %1975, %v301_v19   ;;  %v2479_v19 = vld [vmem:[%s3855_s1 + $0x10] sm:$0xff] }
  0x24   :  { %319 = vmatpush.msra.mxu2 %v2438_v12 }
  0x26   :  { %320 = vmatpush.msra.mxu2 %v2443_v13 }
  0x28   :  { %503 = vperm.xlu2 %1976, %v285_v37   ;;  %321 = vmatpush.msra.mxu2 %v2449_v14 }
  0x2a   :  { %693 = vperm.xlu0 %1974, %v302_v20   ;;  %322 = vmatpush.msra.mxu2 %v2455_v15  ;;  %v2486_v20 = vld [vmem:[%s3855_s1 + $0x8] sm:$0xff] }
  0x2b   :  { %559 = vperm.xlu1 %1975, %v293_v21   ;;  %v2492_v21 = vld [vmem:[%s3855_s1] sm:$0xff] }
  0x2c   :  { %323 = vmatpush.msra.mxu2 %v2462_v16 }
  0x2e   :  { %324 = vmatpush.msra.mxu2 %v2467_v17 }
  0x30   :  { %544 = vperm.xlu2 %1976, %v290_v38   ;;  %325 = vmatpush.msra.mxu2 %v2473_v18 }
  0x32   :  { %549 = vperm.xlu0 %1974, %v291_v22   ;;  %326 = vmatpush.msra.mxu2 %v2479_v19  ;;  %v208_v22 = vlaneseq }
  0x33   :  { %698 = vperm.xlu1 %1975, %v303_v23  }
  0x34   :  { %327 = vmatpush.msra.mxu2 %v2486_v20  ;;  %v209_v23 = vand.u32 127, %v208_v22  ;;  %v2722_v22 = vld [vmem:[%s3858_s4 + $0x18] sm:$0xff] }
  0x36   :  { %328 = vmatpush.msra.mxu2 %v2492_v21  ;;  %vm210_vm6 = vcmp.lt.s32.totalorder %v209_v23, 6  ;;  %v2731_v23 = vld [vmem:[%s3858_s4 + $0x10] sm:$0xff] }
  0x38   :  { %708 = vperm.xlu2 %1976, %v305_v39  }
  0x3a   :  { %713 = vperm.xlu0 %1974, %v306_v24  }
  0x3b   :  { %554 = vperm.xlu1 %1975, %v292_v25  }
  0x40   :  { %564 = vperm.xlu2 %1976, %v294_v40  }
  0x42   :  { %569 = vperm.xlu0 %1974, %v295_v26   ;;  %v2160_v26 = vmov 0.0  }
  0x43   :  { %718 = vperm.xlu1 %1975, %v307_v27   ;;  %v2495_v27 = vsel %vm210_vm6, 1.0, %v2160_v26 }
  0x48   :  { %703 = vperm.xlu2 %1976, %v304_v41  }
  0x4a   :  { %579 = vperm.xlu0 %1974, %v297_v28  }
  0x4b   :  { %574 = vperm.xlu1 %1975, %v296_v29  }
  0x50   :  { %728 = vperm.xlu2 %1976, %v309_v44   ;;  %v2540_v44 = vld [vmem:[%s3864_s10 + $0x10] sm:$0xff] }
  0x52   :  { %733 = vperm.xlu0 %1974, %v310_v30  }
  0x53   :  { %584 = vperm.xlu1 %1975, %v298_v31  }
  0x58   :  { %723 = vperm.xlu2 %1976, %v308_v49   ;;  %v2585_v49 = vld [vmem:[%s3864_s10 + $0x38] sm:$0xff] }
  0x5a   :  { %589 = vperm.xlu0 %1974, %v299_v33  }
  0x5b   :  { %743 = vperm.xlu1 %1975, %v312_v34  }
  0x60   :  { %738 = vperm.xlu2 %1976, %v311_v62   ;;  %v2675_v62 = vld [vmem:[%s3864_s10 + $0x68] sm:$0xff] }
  0x68   :  { %594 = vperm.xlu2 %1976, %v300_v3  }
  0x6a   :  { %v149_v24 = vpop.permute.xlu2 %148 }
  0x72   :  { %v154_v31 = vpop.permute.xlu2 %153 }
  0x74   :  { %v82_v43 = vpop.permute.xlu0 %81 }
  0x75   :  { %v72_v45 = vpop.permute.xlu1 %71 }
  0x7c   :  { %v77_v47 = vpop.permute.xlu0 %76 }
  0x7d   :  { %v67_v54 = vpop.permute.xlu1 %66 }
  0x84   :  { %v159_v35 = vpop.permute.xlu0 %158 }
  0x85   :  { %v164_v37 = vpop.permute.xlu1 %163 }
  0x8a   :  { %v114_v50 = vpop.f32.mrf.mxu0 }
  0x8b   :  { %v115_v55 = vadd.f32 %v114_v50, %v67_v54  ;;  %v2592_v50 = vld [vmem:[%s3864_s10 + $0x40] sm:$0xff]  ;;  %v2618_v54 = vld [vmem:[%s3858_s4 + $0x78] sm:$0xff] }
  0x8c   :  { %472 = vmatpush.msrb.mxu2 %v2618_v54 }
  0x8d   :  { %v130_v61 = vmul.f32 0.01, %v115_v55  ;;  %vm126_vm4 = vcmp.gt.f32.partialorder %v115_v55, 0.0 }
  0x8e   :  { %v117_v42 = vpop.f32.mrf.mxu3 }
  0x8f   :  { %v118_v52 = vadd.f32 %v117_v42, %v72_v45  ;;  %v134_v2 = vsel %vm126_vm4, %v115_v55, %v130_v61  ;;  %v2518_v42 = vld [vmem:[%s3864_s10] sm:$0xff]  ;;  %v2551_v45 = vld [vmem:[%s3864_s10 + $0x18] sm:$0xff]  ;;  %v2626_v55 = vld [vmem:[%s3858_s4 + $0x70] sm:$0xff] }
  0x90   :  { %473 = vmatpush.msrb.mxu2 %v2626_v55  ;;  %v2668_v61 = vld [vmem:[%s3858_s4 + $0x48] sm:$0xff] }
  0x91   :  { %v131_v59 = vmul.f32 0.01, %v118_v52  ;;  %vm127_vm3 = vcmp.gt.f32.partialorder %v118_v52, 0.0 }
  0x93   :  { %v135_v63 = vsel %vm127_vm3, %v118_v52, %v131_v59  ;;  %v2606_v52 = vld [vmem:[%s3864_s10 + $0x50] sm:$0xff]  ;;  %v2652_v59 = vld [vmem:[%s3858_s4 + $0x58] sm:$0xff] }
  0x96   :  { %v120_v46 = vpop.f32.mrf.mxu3 }
  0x97   :  { %v121_v48 = vadd.f32 %v120_v46, %v77_v47  ;;  %v2562_v46 = vld [vmem:[%s3864_s10 + $0x20] sm:$0xff]  ;;  %v2571_v47 = vld [vmem:[%s3864_s10 + $0x28] sm:$0xff] }
  0x99   :  { %v132_v57 = vmul.f32 0.01, %v121_v48  ;;  %vm128_vm2 = vcmp.gt.f32.partialorder %v121_v48, 0.0 }
  0x9b   :  { %v136_v60 = vsel %vm128_vm2, %v121_v48, %v132_v57  ;;  %v2578_v48 = vld [vmem:[%s3864_s10 + $0x30] sm:$0xff]  ;;  %v2640_v57 = vld [vmem:[%s3864_s10 + $0x60] sm:$0xff] }
  0x9e   :  { %v123_v51 = vpop.f32.mrf.mxu3 }
  0x9f   :  { %v124_v53 = vadd.f32 %v123_v51, %v82_v43  ;;  %v2529_v43 = vld [vmem:[%s3864_s10 + $0x8] sm:$0xff] }
  0xa0   :  { %v2599_v51 = vld [vmem:[%s3864_s10 + $0x48] sm:$0xff] }
  0xa1   :  { %vm129_vm1 = vcmp.gt.f32.partialorder %v124_v53, 0.0  ;;  %v133_v56 = vmul.f32 0.01, %v124_v53 }
  0xa3   :  { %v137_v58 = vsel %vm129_vm1, %v124_v53, %v133_v56  ;;  %v2613_v53 = vld [vmem:[%s3864_s10 + $0x58] sm:$0xff]  ;;  %v2633_v56 = vld [vmem:[%s3858_s4 + $0x68] sm:$0xff] }
  0xa4   :  { %191 = vmatpush.msrb.mxu0 %v137_v58  ;;  %1965 = vmatpush.msra.mxu1 %v137_v58  ;;  %v2645_v58 = vld [vmem:[%s3858_s4 + $0x60] sm:$0xff] }
  0xa5   :  { %474 = vmatpush.msrb.mxu2 %v2633_v56 }
  0xa6   :  { %192 = vmatpush.msrb.mxu0 %v136_v60  ;;  %1966 = vmatpush.msra.mxu1 %v136_v60  ;;  %v2657_v60 = vld [vmem:[%s3858_s4 + $0x50] sm:$0xff] }
  0xa7   :  { %475 = vmatpush.msrb.mxu2 %v2645_v58 }
  0xa8   :  { %193 = vmatpush.msrb.mxu0 %v135_v63  ;;  %1967 = vmatpush.msra.mxu1 %v135_v63  ;;  %v2680_v63 = vld [vmem:[%s3858_s4 + $0x40] sm:$0xff] }
  0xa9   :  { %476 = vmatpush.msrb.mxu2 %v2652_v59 }
  0xaa   :  { %194 = vmatpush.msrb.mxu0 %v134_v2  ;;  %1968 = vmatpush.msra.mxu1 %v134_v2  ;;  %v2703_v2 = vld [vmem:[%s3858_s4 + $0x28] sm:$0xff] }
  0xab   :  { %1847 = vmatmul.msk.f32.vlgmr.msrb.gmra.mxu0 %vm166_vm5, %v138_v0  ;;  %1848 = vmatmul.msk.f32.vlgmr.msra.gmra.mxu1 %vm166_vm5, %v139_v1  ;;  %v2687_v0 = vld [vmem:[%s3858_s4 + $0x38] sm:$0xff]  ;;  %v2696_v1 = vld [vmem:[%s3858_s4 + $0x30] sm:$0xff] }
  0xac   :  { %477 = vmatpush.msrb.mxu2 %v2657_v60 }
  0xae   :  { %478 = vmatpush.msrb.mxu2 %v2668_v61 }
  0xb0   :  { %479 = vmatpush.msrb.mxu2 %v2680_v63 }
  0xb2   :  { %480 = vmatpush.msrb.mxu2 %v2687_v0 }
  0xb3   :  { %1849 = vmatmul.msk.f32.gmra.mxu1 %vm166_vm5, %v140_v4  ;;  %v2710_v4 = vld [vmem:[%s3864_s10 + $0x70] sm:$0xff] }
  0xb4   :  { %481 = vmatpush.msrb.mxu2 %v2696_v1 }
  0xb6   :  { %482 = vmatpush.msrb.mxu2 %v2703_v2 }
  0xbb   :  { %1850 = vmatmul.msk.f32.gmra.mxu1 %vm166_vm5, %v141_v5  ;;  %v2715_v5 = vld [vmem:[%s3858_s4 + $0x20] sm:$0xff] }
  0xbc   :  { %483 = vmatpush.msrb.mxu2 %v2715_v5 }
  0xbe   :  { %484 = vmatpush.msrb.mxu2 %v2722_v22 }
  0xc0   :  { %485 = vmatpush.msrb.mxu2 %v2731_v23 }
 0x128   :  { %v196_v25 = vpop.f32.mrf.mxu0  ;;  %v199_v28 = vpop.f32.mrf.mxu1 }
 0x129   :  { %v197_v29 = vadd.f32 %v196_v25, %v149_v24  ;;  %v200_v32 = vadd.f32 %v199_v28, %v154_v31  ;;  %v2738_v24 = vld [vmem:[%s3858_s4 + $0x8] sm:$0xff]  ;;  %v2743_v25 = vld [vmem:[%s3858_s4] sm:$0xff]  ;;  %v2750_v28 = vld [vmem:[%s3864_s10 + $0x78] sm:$0xff] }
 0x12a   :  { %486 = vmatpush.msrb.mxu2 %v2738_v24 }
 0x12b   :  { %v2498_v30 = vmul.f32 %v2495_v27, %v197_v29  ;;  %v2502_v34 = vmul.f32 %v2495_v27, %v200_v32  ;;  %v2763_v29 = vld [vmem:[%s3856_s2 + $0x8] sm:$0xff]  ;;  %v2774_v32 = vld [vmem:[%s3856_s2 + $0x10] sm:$0xff] }
 0x12c   :  { %487 = vmatpush.msrb.mxu2 %v2743_v25 }
 0x12d   :  { %329 = vmatmul.f32.vlgmr.msra.gmra.mxu2 %v2498_v30 }
 0x12e   :  { %950 = vmatpush.msra.mxu2 %v2402_v6 }
 0x130   :  { %v202_v33 = vpop.f32.mrf.mxu1  ;;  %951 = vmatpush.msra.mxu2 %v2407_v7 }
 0x131   :  { %v203_v36 = vadd.f32 %v202_v33, %v159_v35 }
 0x132   :  { %952 = vmatpush.msra.mxu2 %v2414_v8 }
 0x133   :  { %v2506_v40 = vmul.f32 %v2495_v27, %v203_v36 }
 0x134   :  { %953 = vmatpush.msra.mxu2 %v2419_v9 }
 0x135   :  { %332 = vmatmul.f32.gmra.mxu2 %v2502_v34 }
 0x136   :  { %954 = vmatpush.msra.mxu2 %v2425_v10 }
 0x138   :  { %v205_v38 = vpop.f32.mrf.mxu1  ;;  %955 = vmatpush.msra.mxu2 %v2431_v11 }
 0x139   :  { %v206_v39 = vadd.f32 %v205_v38, %v164_v37 }
 0x13a   :  { %956 = vmatpush.msra.mxu2 %v2438_v12 }
 0x13b   :  { %v2509_v41 = vmul.f32 %v2495_v27, %v206_v39 }
 0x13c   :  { %957 = vmatpush.msra.mxu2 %v2443_v13 }
 0x13d   :  { %335 = vmatmul.f32.gmra.mxu2 %v2506_v40  ;;  %419 = vmatpush.msrb.mxu3 %v2509_v41 }
 0x13e   :  { %958 = vmatpush.msra.mxu2 %v2449_v14 }
 0x13f   :  { %420 = vmatpush.msrb.mxu3 %v2506_v40 }
 0x140   :  { %959 = vmatpush.msra.mxu2 %v2455_v15 }
 0x141   :  { %421 = vmatpush.msrb.mxu3 %v2502_v34 }
 0x142   :  { %960 = vmatpush.msra.mxu2 %v2462_v16 }
 0x143   :  { %422 = vmatpush.msrb.mxu3 %v2498_v30 }
 0x144   :  { %1852 = vmatmul.msk.f32.vlgmr.msrb.gmra.mxu3 %vm166_vm5, %v2518_v42  ;;  %961 = vmatpush.msra.mxu2 %v2467_v17 }
 0x145   :  { %338 = vmatmul.f32.gmra.mxu2 %v2509_v41  ;;  %1363 = vmatpush.msra.mxu3 %v2402_v6  ;;  %v2769_v6 = vld [vmem:[%s3856_s2] sm:$0xff] }
 0x146   :  { %962 = vmatpush.msra.mxu2 %v2473_v18 }
 0x147   :  { %1364 = vmatpush.msra.mxu3 %v2407_v7 }
 0x148   :  { %963 = vmatpush.msra.mxu2 %v2479_v19 }
 0x149   :  { %1365 = vmatpush.msra.mxu3 %v2414_v8 }
 0x14a   :  { %964 = vmatpush.msra.mxu2 %v2486_v20 }
 0x14b   :  { %1366 = vmatpush.msra.mxu3 %v2419_v9  ;;  %v2784_v9 = vld [vmem:[%s3856_s2 + $0x18] sm:$0xff] }
 0x14c   :  { %1853 = vmatmul.msk.f32.gmra.mxu3 %vm166_vm5, %v2529_v43  ;;  %965 = vmatpush.msra.mxu2 %v2492_v21 }
 0x14d   :  { %1367 = vmatpush.msra.mxu3 %v2425_v10 }
 0x14f   :  { %1368 = vmatpush.msra.mxu3 %v2431_v11 }
 0x151   :  { %1369 = vmatpush.msra.mxu3 %v2438_v12 }
 0x153   :  { %1370 = vmatpush.msra.mxu3 %v2443_v13  ;;  %v2798_v13 = vld [vmem:[%s3857_s3] sm:$0xff] }
 0x154   :  { %1854 = vmatmul.msk.f32.gmra.mxu3 %vm166_vm5, %v2540_v44 }
 0x155   :  { %1371 = vmatpush.msra.mxu3 %v2449_v14 }
 0x157   :  { %1372 = vmatpush.msra.mxu3 %v2455_v15 }
 0x159   :  { %1373 = vmatpush.msra.mxu3 %v2462_v16  ;;  %v2807_v16 = vld [vmem:[%s3857_s3 + $0x8] sm:$0xff] }
 0x15b   :  { %1374 = vmatpush.msra.mxu3 %v2467_v17 }
 0x15c   :  { %1855 = vmatmul.msk.f32.gmra.mxu3 %vm166_vm5, %v2551_v45 }
 0x15d   :  { %1375 = vmatpush.msra.mxu3 %v2473_v18  ;;  %v2817_v18 = vld [vmem:[%s3857_s3 + $0x10] sm:$0xff] }
 0x15f   :  { %1376 = vmatpush.msra.mxu3 %v2479_v19 }
 0x161   :  { %1377 = vmatpush.msra.mxu3 %v2486_v20  ;;  %v2827_v20 = vld [vmem:[%s3857_s3 + $0x18] sm:$0xff] }
 0x163   :  { %1378 = vmatpush.msra.mxu3 %v2492_v21 }
 0x164   :  { %1856 = vmatmul.msk.f32.gmra.mxu3 %vm166_vm5, %v2562_v46 }
 0x165   :  { %1474 = vmatpush.msrb.mxu3 %v2618_v54 }
 0x167   :  { %1475 = vmatpush.msrb.mxu3 %v2626_v55 }
 0x169   :  { %1476 = vmatpush.msrb.mxu3 %v2633_v56 }
 0x16b   :  { %1477 = vmatpush.msrb.mxu3 %v2645_v58 }
 0x16c   :  { %1857 = vmatmul.msk.f32.gmra.mxu3 %vm166_vm5, %v2571_v47 }
 0x16d   :  { %1478 = vmatpush.msrb.mxu3 %v2652_v59 }
 0x16f   :  { %1479 = vmatpush.msrb.mxu3 %v2657_v60 }
 0x171   :  { %1480 = vmatpush.msrb.mxu3 %v2668_v61 }
 0x173   :  { %1481 = vmatpush.msrb.mxu3 %v2680_v63 }
 0x174   :  { %1858 = vmatmul.msk.f32.gmra.mxu3 %vm166_vm5, %v2578_v48 }
 0x175   :  { %1482 = vmatpush.msrb.mxu3 %v2687_v0 }
 0x177   :  { %1483 = vmatpush.msrb.mxu3 %v2696_v1 }
 0x179   :  { %1484 = vmatpush.msrb.mxu3 %v2703_v2 }
 0x17b   :  { %1485 = vmatpush.msrb.mxu3 %v2715_v5 }
 0x17c   :  { %1859 = vmatmul.msk.f32.gmra.mxu3 %vm166_vm5, %v2585_v49 }
 0x17d   :  { %1486 = vmatpush.msrb.mxu3 %v2722_v22 }
 0x17f   :  { %1487 = vmatpush.msrb.mxu3 %v2731_v23 }
 0x181   :  { %1488 = vmatpush.msrb.mxu3 %v2738_v24 }
 0x183   :  { %1489 = vmatpush.msrb.mxu3 %v2743_v25 }
 0x184   :  { %1860 = vmatmul.msk.f32.gmra.mxu3 %vm166_vm5, %v2592_v50 }
 0x18c   :  { %1861 = vmatmul.msk.f32.gmra.mxu3 %vm166_vm5, %v2599_v51 }
 0x194   :  { %1862 = vmatmul.msk.f32.gmra.mxu3 %vm166_vm5, %v2606_v52 }
 0x19c   :  { %1863 = vmatmul.msk.f32.gmra.mxu3 %vm166_vm5, %v2613_v53 }
 0x1a4   :  { %1864 = vmatmul.msk.f32.gmra.mxu3 %vm166_vm5, %v2640_v57 }
 0x1ac   :  { %1865 = vmatmul.msk.f32.gmra.mxu3 %vm166_vm5, %v2675_v62 }
 0x1b0   :  { %v330_v3 = vpop.f32.mrf.mxu2 }
 0x1b1   :  { %v342_v8 = vmul.f32 %v330_v3, %v2769_v6 }
 0x1b4   :  { %1866 = vmatmul.msk.f32.gmra.mxu3 %vm166_vm5, %v2710_v4 }
 0x1b8   :  { %v333_v26 = vpop.f32.mrf.mxu2 }
 0x1b9   :  { %v343_v7 = vmul.f32 %v333_v26, %v2763_v29 }
 0x1bb   :  { %v346_v35 = vadd.f32 %v343_v7, %v342_v8 }
 0x1bc   :  { %1867 = vmatmul.msk.f32.gmra.mxu3 %vm166_vm5, %v2750_v28 }
 0x1c0   :  { %v336_v31 = vpop.f32.mrf.mxu2 }
 0x1c1   :  { %v344_v33 = vmul.f32 %v336_v31, %v2774_v32  ;;  %v2842_v31 = vpop.permute.xlu1 %508 }
 0x1c3   :  { %v347_v37 = vadd.f32 %v346_v35, %v344_v33 }
 0x1c8   :  { %v339_v36 = vpop.f32.mrf.mxu2 }
 0x1c9   :  { %v345_v38 = vmul.f32 %v339_v36, %v2784_v9 }
 0x1cb   :  { %v348_v10 = vadd.f32 %v347_v37, %v345_v38 }
 0x1cd   :  { %v349_v39 = vrot.slane %v348_v10, 4 }
 0x1cf   :  { %v350_v11 = vadd.f32 %v349_v39, %v348_v10 }
 0x1d1   :  { %v351_v3 = vrot.slane %v350_v11, 2 }
 0x1d3   :  { %v352_v26 = vadd.f32 %v351_v3, %v350_v11  ;;  %v2852_v3 = vld [vmem:[%s3866_s12] sm:$0xff] }
 0x1d4   :  { %3922 = vst [vmem:[#allocation5_spill] sm:$0xff] %v2852_v3 }
 0x1d5   :  { %v353_v12 = vrot.slane %v352_v26, 1 }
 0x1d7   :  { %v354_v14 = vadd.f32 %v353_v12, %v352_v26  ;;  %v2859_v12 = vld [vmem:[%s3866_s12 + $0x8] sm:$0xff] }
 0x1d8   :  { %3923 = vst [vmem:[#allocation6_spill] sm:$0xff] %v2859_v12 }
 0x1d9   :  { %v355_v15 = vmul.f32 %v354_v14, %v2798_v13  ;;  %v356_v17 = vmul.f32 %v354_v14, %v2807_v16  ;;  %v357_v19 = vmul.f32 %v354_v14, %v2817_v18  ;;  %v358_v21 = vmul.f32 %v354_v14, %v2827_v20  ;;  %v2866_v14 = vld [vmem:[%s3866_s12 + $0x10] sm:$0xff] }
 0x1da   :  { %3924 = vst [vmem:[#allocation7_spill] sm:$0xff] %v2866_v14 }
 0x1db   :  { %488 = vmatmul.f32.vlgmr.msrb.gmra.mxu2 %v355_v15  ;;  %v2873_v15 = vld [vmem:[%s3866_s12 + $0x18] sm:$0xff] }
 0x1dc   :  { %1061 = vmatpush.msrb.mxu2 %v2618_v54  ;;  %v424_v54 = vpop.f32.mrf.mxu3  ;;  %3925 = vst [vmem:[#allocation8_spill] sm:$0xff] %v2873_v15 }
 0x1de   :  { %1062 = vmatpush.msrb.mxu2 %v2626_v55 }
 0x1e0   :  { %1063 = vmatpush.msrb.mxu2 %v2633_v56 }
 0x1e2   :  { %1064 = vmatpush.msrb.mxu2 %v2645_v58 }
 0x1e3   :  { %491 = vmatmul.f32.gmra.mxu2 %v356_v17  ;;  %v2880_v17 = vld [vmem:[%s3866_s12 + $0x20] sm:$0xff] }
 0x1e4   :  { %1065 = vmatpush.msrb.mxu2 %v2652_v59  ;;  %v427_v56 = vpop.f32.mrf.mxu3  ;;  %3926 = vst [vmem:[#allocation9_spill] sm:$0xff] %v2880_v17 }
 0x1e6   :  { %1066 = vmatpush.msrb.mxu2 %v2657_v60 }
 0x1e8   :  { %1067 = vmatpush.msrb.mxu2 %v2668_v61  ;;  %v2837_v61 = vpop.permute.xlu2 %518 }
 0x1ea   :  { %1068 = vmatpush.msrb.mxu2 %v2680_v63 }
 0x1eb   :  { %494 = vmatmul.f32.gmra.mxu2 %v357_v19  ;;  %v2887_v19 = vld [vmem:[%s3866_s12 + $0x28] sm:$0xff] }
 0x1ec   :  { %1069 = vmatpush.msrb.mxu2 %v2687_v0  ;;  %v430_v59 = vpop.f32.mrf.mxu3  ;;  %v2839_v0 = vpop.permute.xlu0 %513  ;;  %3927 = vst [vmem:[#allocation10_spill] sm:$0xff] %v2887_v19 }
 0x1ee   :  { %1070 = vmatpush.msrb.mxu2 %v2696_v1 }
 0x1f0   :  { %1071 = vmatpush.msrb.mxu2 %v2703_v2  ;;  %v2846_v8 = vpop.permute.xlu2 %503 }
 0x1f2   :  { %1072 = vmatpush.msrb.mxu2 %v2715_v5 }
 0x1f3   :  { %497 = vmatmul.f32.gmra.mxu2 %v358_v21  ;;  %v2894_v21 = vld [vmem:[%s3866_s12 + $0x30] sm:$0xff] }
 0x1f4   :  { %1073 = vmatpush.msrb.mxu2 %v2722_v22  ;;  %v433_v2 = vpop.f32.mrf.mxu3  ;;  %3928 = vst [vmem:[#allocation11_spill] sm:$0xff] %v2894_v21 }
 0x1f6   :  { %1074 = vmatpush.msrb.mxu2 %v2731_v23 }
 0x1f8   :  { %1075 = vmatpush.msrb.mxu2 %v2738_v24 }
 0x1fa   :  { %1076 = vmatpush.msrb.mxu2 %v2743_v25 }
 0x25e   :  { %v489_v55 = vpop.f32.mrf.mxu2 }
 0x25f   :  { %v490_v22 = vadd.f32 %v489_v55, %v424_v54  ;;  %v2901_v54 = vld [vmem:[%s3866_s12 + $0x38] sm:$0xff]  ;;  %v2908_v55 = vld [vmem:[%s3866_s12 + $0x40] sm:$0xff] }
 0x260   :  { %3929 = vst [vmem:[#allocation12_spill] sm:$0xff] %v2901_v54 }
 0x261   :  { %v521_v33 = vadd.f32 %v2846_v8, %v490_v22  ;;  %3930 = vst [vmem:[#allocation13_spill] sm:$0xff] %v2908_v55  ;;  %v2933_v22 = vpop.permute.xlu1 %688 }
 0x262   :  { %3934 = vst [vmem:[#allocation17_spill] sm:$0xff] %v2933_v22 }
 0x263   :  { %v529_v39 = vmul.f32 0.01, %v521_v33  ;;  %vm525_vm10 = vcmp.gt.f32.partialorder %v521_v33, 0.0 }
 0x265   :  { %v533_v26 = vsel %vm525_vm10, %v521_v33, %v529_v39 }
 0x266   :  { %v492_v58 = vpop.f32.mrf.mxu2 }
 0x267   :  { %v493_v1 = vadd.f32 %v492_v58, %v427_v56  ;;  %v2915_v56 = vld [vmem:[%s3866_s12 + $0x48] sm:$0xff]  ;;  %v2922_v58 = vld [vmem:[%s3866_s12 + $0x50] sm:$0xff] }
 0x268   :  { %3931 = vst [vmem:[#allocation14_spill] sm:$0xff] %v2915_v56 }
 0x269   :  { %v522_v25 = vadd.f32 %v2842_v31, %v493_v1  ;;  %3932 = vst [vmem:[#allocation15_spill] sm:$0xff] %v2922_v58 }
 0x26b   :  { %v530_v38 = vmul.f32 0.01, %v522_v25  ;;  %vm526_vm9 = vcmp.gt.f32.partialorder %v522_v25, 0.0 }
 0x26d   :  { %v534_v11 = vsel %vm526_vm9, %v522_v25, %v530_v38 }
 0x26e   :  { %v495_v60 = vpop.f32.mrf.mxu2 }
 0x26f   :  { %v496_v63 = vadd.f32 %v495_v60, %v430_v59  ;;  %v2929_v59 = vld [vmem:[%s3866_s12 + $0x58] sm:$0xff]  ;;  %v436_v60 = vpop.f32.mrf.mxu3 }
 0x270   :  { %3933 = vst [vmem:[#allocation16_spill] sm:$0xff] %v2929_v59  ;;  %v746_v33 = vadd.f32 %v2933_v22, %v436_v60 }
 0x271   :  { %v523_v23 = vadd.f32 %v2839_v0, %v496_v63 }
 0x273   :  { %v531_v36 = vmul.f32 0.01, %v523_v23  ;;  %vm527_vm8 = vcmp.gt.f32.partialorder %v523_v23, 0.0 }
 0x275   :  { %v535_v10 = vsel %vm527_vm8, %v523_v23, %v531_v36  ;;  %v2935_v23 = vpop.permute.xlu0 %539  ;;  %v2941_v36 = vpop.permute.xlu1 %559 }
 0x276   :  { %v498_v5 = vpop.f32.mrf.mxu2  ;;  %3935 = vst [vmem:[#allocation18_spill] sm:$0xff] %v2935_v23 }
 0x277   :  { %v499_v24 = vadd.f32 %v498_v5, %v433_v2  ;;  %v439_v63 = vpop.f32.mrf.mxu3  ;;  %3937 = vst [vmem:[#allocation20_spill] sm:$0xff] %v2941_v36 }
 0x279   :  { %v524_v7 = vadd.f32 %v2837_v61, %v499_v24  ;;  %v2937_v24 = vpop.permute.xlu2 %544 }
 0x27a   :  { %3936 = vst [vmem:[#allocation19_spill] sm:$0xff] %v2937_v24 }
 0x27b   :  { %v532_v35 = vmul.f32 0.01, %v524_v7  ;;  %vm528_vm7 = vcmp.gt.f32.partialorder %v524_v7, 0.0 }
 0x27d   :  { %v536_v37 = vsel %vm528_vm7, %v524_v7, %v532_v35 }
 0x27e   :  { %645 = vmatpush.msra.mxu0 %v536_v37  ;;  %v2943_v37 = vpop.permute.xlu0 %693 }
 0x27f   :  { %v442_v1 = vpop.f32.mrf.mxu3  ;;  %3938 = vst [vmem:[#allocation21_spill] sm:$0xff] %v2943_v37 }
 0x280   :  { %646 = vmatpush.msra.mxu0 %v535_v10 }
 0x281   :  { %v2945_v10 = vpop.permute.xlu2 %708 }
 0x282   :  { %647 = vmatpush.msra.mxu0 %v534_v11  ;;  %3939 = vst [vmem:[#allocation22_spill] sm:$0xff] %v2945_v10 }
 0x284   :  { %648 = vmatpush.msra.mxu0 %v533_v26 }
 0x285   :  { %1868 = vmatmul.msk.f32.vlgmr.msra.gmra.mxu0 %vm166_vm5, %v2852_v3 }
 0x286   :  { %v2951_v60 = vpop.permute.xlu0 %549 }
 0x287   :  { %v445_v5 = vpop.f32.mrf.mxu3  ;;  %3941 = vst [vmem:[#allocation24_spill] sm:$0xff] %v2951_v60 }
 0x289   :  { %v2953_v22 = vpop.permute.xlu2 %564 }
 0x28a   :  { %3942 = vst [vmem:[#allocation25_spill] sm:$0xff] %v2953_v22 }
 0x28d   :  { %1869 = vmatmul.msk.f32.gmra.mxu0 %vm166_vm5, %v2859_v12 }
 0x28f   :  { %v448_v35 = vpop.f32.mrf.mxu3 }
 0x295   :  { %1870 = vmatmul.msk.f32.gmra.mxu0 %vm166_vm5, %v2866_v14 }
 0x29d   :  { %1871 = vmatmul.msk.f32.gmra.mxu0 %vm166_vm5, %v2873_v15 }
 0x2a5   :  { %1872 = vmatmul.msk.f32.gmra.mxu0 %vm166_vm5, %v2880_v17 }
 0x2ad   :  { %1873 = vmatmul.msk.f32.gmra.mxu0 %vm166_vm5, %v2887_v19 }
 0x2b5   :  { %1874 = vmatmul.msk.f32.gmra.mxu0 %vm166_vm5, %v2894_v21  ;;  %v2964_v21 = vpop.permute.xlu2 %703 }
 0x2b6   :  { %3944 = vst [vmem:[#allocation27_spill] sm:$0xff] %v2964_v21 }
 0x2bd   :  { %1875 = vmatmul.msk.f32.gmra.mxu0 %vm166_vm5, %v2901_v54 }
 0x2c5   :  { %1876 = vmatmul.msk.f32.gmra.mxu0 %vm166_vm5, %v2908_v55 }
 0x2cd   :  { %1877 = vmatmul.msk.f32.gmra.mxu0 %vm166_vm5, %v2915_v56 }
 0x2d5   :  { %1878 = vmatmul.msk.f32.gmra.mxu0 %vm166_vm5, %v2922_v58  ;;  %v451_v58 = vpop.f32.mrf.mxu3 }
 0x2dd   :  { %1879 = vmatmul.msk.f32.gmra.mxu0 %vm166_vm5, %v2929_v59  ;;  %v747_v59 = vadd.f32 %v2943_v37, %v439_v63  ;;  %v454_v63 = vpop.f32.mrf.mxu3 }
 0x302   :  { %v650_v2 = vpop.f32.mrf.mxu0 }
 0x303   :  { %v651_v7 = vadd.f32 %v650_v2, %v2935_v23  ;;  %v2949_v2 = vpop.permute.xlu1 %698 }
 0x304   :  { %3940 = vst [vmem:[#allocation23_spill] sm:$0xff] %v2949_v2 }
 0x305   :  { %v758_v38 = vadd.f32 %v746_v33, %v651_v7 }
 0x307   :  { %v1880_v11 = vmul.f32 -1.442695, %v758_v38  ;;  %v748_v38 = vadd.f32 %v2949_v2, %v442_v1 }
 0x309   :  { %1977 = vpow2.f32 %v1880_v11 }
 0x30a   :  { %v653_v25 = vpop.f32.mrf.mxu0 }
 0x30b   :  { %v654_v26 = vadd.f32 %v653_v25, %v2937_v24  ;;  %v2959_v11 = vpop.permute.xlu1 %554 }
 0x30c   :  { %3943 = vst [vmem:[#allocation26_spill] sm:$0xff] %v2959_v11 }
 0x30d   :  { %v759_v56 = vadd.f32 %v747_v59, %v654_v26  ;;  %v750_v26 = vadd.f32 %v2945_v10, %v448_v35 }
 0x30f   :  { %v1881_v55 = vmul.f32 -1.442695, %v759_v56  ;;  %v1978_v33 = vpop.eup %1977 }
 0x310   :  { %v2957_v24 = vadd.f32 1.0, %v1978_v33 }
 0x311   :  { %1979 = vpow2.f32 %v1881_v55  ;;  %v2967_v55 = vpop.permute.xlu0 %713 }
 0x312   :  { %v656_v39 = vpop.f32.mrf.mxu0  ;;  %1981 = vrcp.f32 %v2957_v24  ;;  %3945 = vst [vmem:[#allocation28_spill] sm:$0xff] %v2967_v55  ;;  %vm783_vm12 = vweird.f32 %v2957_v24 }
 0x313   :  { %v657_v7 = vadd.f32 %v656_v39, %v2951_v60  ;;  %v749_v39 = vadd.f32 %v2964_v21, %v445_v5 }
 0x315   :  { %v760_v25 = vadd.f32 %v748_v38, %v657_v7 }
 0x317   :  { %v1882_v37 = vmul.f32 -1.442695, %v760_v25  ;;  %v1980_v1 = vpop.eup %1979  ;;  %v751_v25 = vadd.f32 %v2967_v55, %v451_v58 }
 0x318   :  { %v2970_v2 = vadd.f32 1.0, %v1980_v1  ;;  %v2972_v35 = vpop.eup %1981 }
 0x319   :  { %1983 = vpow2.f32 %v1882_v37  ;;  %vm784_vm11 = vweird.f32 %v2972_v35 }
 0x31a   :  { %v659_v23 = vpop.f32.mrf.mxu0  ;;  %vm3025_vm13 = vmor %vm783_vm12, %vm784_vm11  ;;  %vm798_vm15 = vweird.f32 %v2970_v2 }
 0x31b   :  { %v660_v54 = vadd.f32 %v659_v23, %v2959_v11 }
 0x31d   :  { %v761_v33 = vadd.f32 %v749_v39, %v660_v54  ;;  %v779_v54 = vmul.f32 %v2972_v35, %v2957_v24  ;;  %v2983_v39 = vpop.permute.xlu1 %718 }
 0x31e   :  { %3948 = vst [vmem:[#allocation31_spill] sm:$0xff] %v2983_v39 }
 0x31f   :  { %v1984_v10 = vpop.eup %1983 }
 0x320   :  { %v2985_v58 = vadd.f32 1.0, %v1984_v10 }
 0x322   :  { %v662_v59 = vpop.f32.mrf.mxu0  ;;  %vm813_vm7 = vweird.f32 %v2985_v58 }
 0x323   :  { %v663_v56 = vadd.f32 %v662_v59, %v2941_v36  ;;  %v457_v59 = vpop.f32.mrf.mxu3  ;;  %v1883_v36 = vmul.f32 -1.442695, %v761_v33  ;;  %v780_v33 = vsub.f32 1.0, %v779_v54 }
 0x325   :  { %v838_v7 = vadd.f32 %v750_v26, %v663_v56  ;;  %v2979_v26 = vpop.permute.xlu0 %569  ;;  %v2981_v56 = vpop.permute.xlu2 %728  ;;  %v781_v10 = vmul.f32 %v2972_v35, %v780_v33 }
 0x326   :  { %3946 = vst [vmem:[#allocation29_spill] sm:$0xff] %v2979_v26 }
 0x327   :  { %v1884_v38 = vmul.f32 -1.442695, %v838_v7  ;;  %3947 = vst [vmem:[#allocation30_spill] sm:$0xff] %v2981_v56 }
 0x329   :  { %1985 = vpow2.f32 %v1884_v38 }
 0x32a   :  { %v665_v23 = vpop.f32.mrf.mxu0  ;;  %1987 = vrcp.f32 %v2970_v2 }
 0x32b   :  { %v666_v11 = vadd.f32 %v665_v23, %v2953_v22  ;;  %1989 = vpow2.f32 %v1883_v36  ;;  %v752_v23 = vadd.f32 %v2983_v39, %v454_v63  ;;  %v789_v39 = vand.u32 2147483648, %v2957_v24 }
 0x32d   :  { %v839_v5 = vadd.f32 %v751_v25, %v666_v11  ;;  %v3005_v63 = vpop.permute.xlu0 %579 }
 0x32e   :  { %3949 = vst [vmem:[#allocation32_spill] sm:$0xff] %v3005_v63 }
 0x32f   :  { %v1986_v37 = vpop.eup %1985  ;;  %v1885_v1 = vmul.f32 -1.442695, %v839_v5  ;;  %v460_v5 = vpop.f32.mrf.mxu3 }
 0x330   :  { %v2987_v7 = vadd.f32 1.0, %v1986_v37  ;;  %v2989_v38 = vpop.eup %1987  ;;  %v754_v15 = vadd.f32 %v2981_v56, %v460_v5 }
 0x331   :  { %1991 = vpow2.f32 %v1885_v1  ;;  %v1990_v36 = vpop.eup %1989  ;;  %v794_v37 = vmul.f32 %v2989_v38, %v2970_v2  ;;  %vm799_vm0 = vweird.f32 %v2989_v38 }
 0x332   :  { %1993 = vrcp.f32 %v2987_v7  ;;  %v668_v11 = vpop.f32.mrf.mxu0  ;;  %v3000_v21 = vadd.f32 1.0, %v1990_v36  ;;  %vm863_vm2 = vweird.f32 %v2987_v7  ;;  %v867_v56 = vand.u32 2147483647, %v2987_v7  ;;  %vm3064_vm3 = vmor %vm798_vm15, %vm799_vm0 }
 0x333   :  { %v669_v25 = vadd.f32 %v668_v11, %v2979_v26  ;;  %1995 = vrcp.f32 %v2985_v58  ;;  %v3007_v11 = vpop.permute.xlu2 %723  ;;  %v3014_v26 = vpop.permute.xlu1 %574 }
 0x334   :  { %3950 = vst [vmem:[#allocation33_spill] sm:$0xff] %v3007_v11  ;;  %v753_v36 = vadd.f32 %v3007_v11, %v457_v59  ;;  %vm868_vm8 = vcmp.eq.f32.partialorder %v867_v56, 8.507059e+37  ;;  %vm828_vm15 = vweird.f32 %v3000_v21 }
 0x335   :  { %v840_v22 = vadd.f32 %v752_v23, %v669_v25  ;;  %v782_v23 = vadd.f32 %v2972_v35, %v781_v10  ;;  %v795_v25 = vsub.f32 1.0, %v794_v37  ;;  %3951 = vst [vmem:[#allocation34_spill] sm:$0xff] %v3014_v26  ;;  %v3053_v10 = vpop.permute.xlu0 %733 }
 0x336   :  { %3954 = vst [vmem:[#allocation35_spill] sm:$0xff] %v3053_v10 }
 0x337   :  { %v1992_v54 = vpop.eup %1991  ;;  %v1886_v1 = vmul.f32 -1.442695, %v840_v22  ;;  %v786_v37 = vsel %vm3025_vm13, %v2972_v35, %v782_v23  ;;  %v463_v14 = vpop.f32.mrf.mxu3  ;;  %v802_v23 = vand.u32 2147483647, %v2970_v2 }
 0x338   :  { %v2998_v55 = vpop.eup %1993  ;;  %v3002_v60 = vadd.f32 1.0, %v1992_v54 }
 0x339   :  { %v859_v33 = vmul.f32 %v2998_v55, %v2987_v7  ;;  %1997 = vpow2.f32 %v1886_v1  ;;  %v3012_v22 = vpop.eup %1995  ;;  %v787_v1 = vand.u32 2147483647, %v2957_v24  ;;  %vm864_vm1 = vweird.f32 %v2998_v55 }
 0x33a   :  { %1999 = vrcp.f32 %v3002_v60  ;;  %v671_v54 = vpop.f32.mrf.mxu0  ;;  %vm3068_vm4 = vmor %vm863_vm2, %vm864_vm1  ;;  %vm803_vm6 = vcmp.eq.f32.partialorder %v802_v23, 8.507059e+37  ;;  %vm814_vm9 = vweird.f32 %v3012_v22  ;;  %vm878_vm12 = vweird.f32 %v3002_v60 }
 0x33b   :  { %v860_v19 = vsub.f32 1.0, %v859_v33  ;;  %v672_v17 = vadd.f32 %v671_v54, %v3014_v26  ;;  %2001 = vrcp.f32 %v3000_v21  ;;  %v796_v33 = vmul.f32 %v2989_v38, %v795_v25  ;;  %vm3107_vm11 = vmor %vm813_vm7, %vm814_vm9 }
 0x33c   :  { %v809_v54 = vmul.f32 %v3012_v22, %v2985_v58  ;;  %v790_v26 = vor.u32 1.1754944e-38, %v789_v39  ;;  %vm788_vm14 = vcmp.eq.f32.partialorder %v787_v1, 8.507059e+37 }
 0x33d   :  { %v841_v59 = vadd.f32 %v753_v36, %v672_v17  ;;  %v861_v24 = vmul.f32 %v2998_v55, %v860_v19  ;;  %v797_v39 = vadd.f32 %v2989_v38, %v796_v33 }
 0x33e   :  { %v791_v35 = vsel %vm788_vm14, %v790_v26, %v786_v37  ;;  %v810_v5 = vsub.f32 1.0, %v809_v54  ;;  %v804_v26 = vand.u32 2147483648, %v2970_v2  ;;  %v755_v54 = vadd.f32 %v3053_v10, %v463_v14 }
 0x33f   :  { %v1998_v11 = vpop.eup %1997  ;;  %v1887_v12 = vmul.f32 -1.442695, %v841_v59  ;;  %v869_v59 = vand.u32 2147483648, %v2987_v7  ;;  %v918_v33 = vmul.f32 %v791_v35, %v754_v15  ;;  %v801_v14 = vsel %vm3064_vm3, %v2989_v38, %v797_v39  ;;  %v466_v3 = vpop.f32.mrf.mxu3 }
 0x340   :  { %v3038_v17 = vpop.eup %1999  ;;  %v3040_v36 = vadd.f32 1.0, %v1998_v11  ;;  %v862_v11 = vadd.f32 %v2998_v55, %v861_v24  ;;  %v811_v15 = vmul.f32 %v3012_v22, %v810_v5  ;;  %v805_v35 = vor.u32 1.1754944e-38, %v804_v26 }
 0x341   :  { %v874_v19 = vmul.f32 %v3038_v17, %v3002_v60  ;;  %2003 = vpow2.f32 %v1887_v12  ;;  %v3047_v25 = vpop.eup %2001  ;;  %v819_v38 = vand.u32 2147483648, %v2985_v58  ;;  %vm879_vm10 = vweird.f32 %v3038_v17 }
 0x342   :  { %2005 = vrcp.f32 %v3040_v36  ;;  %v674_v1 = vpop.f32.mrf.mxu0  ;;  %v824_v7 = vmul.f32 %v3047_v25, %v3000_v21  ;;  %v866_v2 = vsel %vm3068_vm4, %v2998_v55, %v862_v11  ;;  %v812_v11 = vadd.f32 %v3012_v22, %v811_v15  ;;  %vm3119_vm13 = vmor %vm878_vm12, %vm879_vm10 }
 0x343   :  { %v875_v37 = vsub.f32 1.0, %v874_v19  ;;  %v675_v12 = vadd.f32 %v674_v1, %v3005_v63  ;;  %v870_v63 = vor.u32 1.1754944e-38, %v869_v59  ;;  %v3092_v59 = vpop.permute.xlu1 %584  ;;  %vm829_vm1 = vweird.f32 %v3047_v25 }
 0x344   :  { %v825_v26 = vsub.f32 1.0, %v824_v7  ;;  %vm3149_vm3 = vmor %vm828_vm15, %vm829_vm1  ;;  %vm893_vm4 = vweird.f32 %v3040_v36 }
 0x345   :  { %v922_v19 = vadd.f32 %v918_v33, %v675_v12  ;;  %v876_v1 = vmul.f32 %v3038_v17, %v875_v37  ;;  %v806_v12 = vsel %vm803_vm6, %v805_v35, %v801_v14  ;;  %v871_v23 = vsel %vm868_vm8, %v870_v63, %v866_v2  ;;  %v3098_v33 = vpop.permute.xlu2 %738 }
 0x346   :  { %3959 = vst [vmem:[#allocation36_spill] sm:$0xff] %v3098_v33  ;;  %v919_v63 = vmul.f32 %v806_v12, %v755_v54  ;;  %v884_v14 = vand.u32 2147483648, %v3002_v60  ;;  %v756_v15 = vadd.f32 %v3098_v33, %v466_v3  ;;  %v930_v7 = vsub.f32 1.0, %v871_v23 }
 0x347   :  { %v2004_v10 = vpop.eup %2003  ;;  %2007 = vtanh.f32 %v922_v19  ;;  %v877_v56 = vadd.f32 %v3038_v17, %v876_v1  ;;  %v882_v35 = vand.u32 2147483647, %v3002_v60  ;;  %v816_v54 = vsel %vm3107_vm11, %v3012_v22, %v812_v11 }
 0x348   :  { %v3084_v39 = vpop.eup %2005  ;;  %v3086_v5 = vadd.f32 1.0, %v2004_v10  ;;  %v817_v10 = vand.u32 2147483647, %v2985_v58  ;;  %v820_v12 = vor.u32 1.1754944e-38, %v819_v38  ;;  %v826_v3 = vmul.f32 %v3047_v25, %v825_v26 }
 0x349   :  { %v889_v55 = vmul.f32 %v3084_v39, %v3040_v36  ;;  %v938_v33 = vmul.f32 %v871_v23, %v2498_v30  ;;  %v881_v60 = vsel %vm3119_vm13, %v3038_v17, %v877_v56  ;;  %v885_v22 = vor.u32 1.1754944e-38, %v884_v14  ;;  %v3136_v56 = vpop.permute.xlu0 %589 }
 0x34a   :  { %2009 = vrcp.f32 %v3086_v5  ;;  %v677_v37 = vpop.f32.mrf.mxu0  ;;  %vm818_vm14 = vcmp.eq.f32.partialorder %v817_v10, 8.507059e+37  ;;  %vm883_vm0 = vcmp.eq.f32.partialorder %v882_v35, 8.507059e+37  ;;  %v827_v23 = vadd.f32 %v3047_v25, %v826_v3 }
 0x34b   :  { %v890_v24 = vsub.f32 1.0, %v889_v55  ;;  %v678_v19 = vadd.f32 %v677_v37, %v3092_v59  ;;  %v821_v11 = vsel %vm818_vm14, %v820_v12, %v816_v54  ;;  %v886_v17 = vsel %vm883_vm0, %v885_v22, %v881_v60  ;;  %v469_v60 = vpop.f32.mrf.mxu3 }
 0x34c   :  { %v832_v14 = vand.u32 2147483647, %v3000_v21  ;;  %vm894_vm2 = vweird.f32 %v3084_v39  ;;  %v920_v35 = vmul.f32 %v821_v11, %v756_v15  ;;  %v931_v54 = vsub.f32 1.0, %v886_v17 }
 0x34d   :  { %v2008_v1 = vpop.eup %2007  ;;  %v923_v55 = vadd.f32 %v919_v63, %v678_v19  ;;  %v891_v19 = vmul.f32 %v3084_v39, %v890_v24  ;;  %v834_v63 = vand.u32 2147483648, %v3000_v21  ;;  %v897_v12 = vand.u32 2147483647, %v3040_v36  ;;  %vm895_vm6 = vmor %vm893_vm4, %vm894_vm2 }
 0x34e   :  { %v934_v37 = vmul.f32 %v2008_v1, %v930_v7  ;;  %v899_v1 = vand.u32 2147483648, %v3040_v36  ;;  %v831_v15 = vsel %vm3149_vm3, %v3047_v25, %v827_v23  ;;  %v939_v21 = vmul.f32 %v886_v17, %v2502_v34  ;;  %v3161_v36 = vpop.permute.xlu1 %743  ;;  %v3164_v23 = vpop.permute.xlu2 %594 }
 0x34f   :  { %2011 = vtanh.f32 %v923_v55  ;;  %vm833_vm7 = vcmp.eq.f32.partialorder %v832_v14, 8.507059e+37  ;;  %vm898_vm8 = vcmp.eq.f32.partialorder %v897_v12, 8.507059e+37  ;;  %v757_v25 = vadd.f32 %v3161_v36, %v469_v60 }
 0x350   :  { %v3129_v38 = vpop.eup %2009  ;;  %v942_v26 = vadd.f32 %v938_v33, %v934_v37  ;;  %v892_v33 = vadd.f32 %v3084_v39, %v891_v19  ;;  %v835_v37 = vor.u32 1.1754944e-38, %v834_v63  ;;  %vm908_vm10 = vweird.f32 %v3086_v5 }
 0x351   :  { %v904_v30 = vmul.f32 %v3129_v38, %v3086_v5  ;;  %vm909_vm9 = vweird.f32 %v3129_v38 }
 0x352   :  { %v680_v10 = vpop.f32.mrf.mxu0  ;;  %v3139_v24 = vmul.f32 %v2495_v27, %v942_v26  ;;  %v896_v22 = vsel %vm895_vm6, %v3084_v39, %v892_v33  ;;  %v900_v26 = vor.u32 1.1754944e-38, %v899_v1  ;;  %v914_v33 = vand.u32 2147483648, %v3086_v5  ;;  %vm910_vm11 = vmor %vm908_vm10, %vm909_vm9 }
 0x353   :  { %v905_v7 = vsub.f32 1.0, %v904_v30  ;;  %v681_v2 = vadd.f32 %v680_v10, %v3136_v56  ;;  %v836_v30 = vsel %vm833_vm7, %v835_v37, %v831_v15 }
 0x354   :  { %966 = vmatmul.f32.vlgmr.msra.gmra.mxu2 %v3139_v24  ;;  %v901_v63 = vsel %vm898_vm8, %v900_v26, %v896_v22  ;;  %v921_v14 = vmul.f32 %v836_v30, %v757_v25 }
 0x355   :  { %v2012_v3 = vpop.eup %2011  ;;  %v924_v58 = vadd.f32 %v920_v35, %v681_v2  ;;  %v906_v11 = vmul.f32 %v3129_v38, %v905_v7  ;;  %v932_v7 = vsub.f32 1.0, %v901_v63  ;;  %v912_v35 = vand.u32 2147483647, %v3086_v5 }
 0x356   :  { %v935_v19 = vmul.f32 %v2012_v3, %v931_v54  ;;  %v940_v12 = vmul.f32 %v901_v63, %v2506_v40 }
 0x357   :  { %2013 = vtanh.f32 %v924_v58  ;;  %v907_v39 = vadd.f32 %v3129_v38, %v906_v11  ;;  %v915_v58 = vor.u32 1.1754944e-38, %v914_v33  ;;  %vm913_vm12 = vcmp.eq.f32.partialorder %v912_v35, 8.507059e+37 }
 0x358   :  { %v943_v10 = vadd.f32 %v939_v21, %v935_v19 }
 0x359   :  { %v911_v3 = vsel %vm910_vm11, %v3129_v38, %v907_v39 }
 0x35a   :  { %v683_v2 = vpop.f32.mrf.mxu0  ;;  %v3167_v34 = vmul.f32 %v2495_v27, %v943_v10  ;;  %v916_v37 = vsel %vm913_vm12, %v915_v58, %v911_v3 }
 0x35b   :  { %v684_v17 = vadd.f32 %v683_v2, %v3164_v23  ;;  %v933_v19 = vsub.f32 1.0, %v916_v37  ;;  %v941_v22 = vmul.f32 %v916_v37, %v2509_v41  ;;  %v3966_v37 = vld [vmem:[#allocation5_spill] sm:$0xff] }
 0x35c   :  { %969 = vmatmul.f32.gmra.mxu2 %v3167_v34 }
 0x35d   :  { %v2014_v1 = vpop.eup %2013  ;;  %v925_v55 = vadd.f32 %v921_v14, %v684_v17 }
 0x35e   :  { %v936_v54 = vmul.f32 %v2014_v1, %v932_v7 }
 0x35f   :  { %2015 = vtanh.f32 %v925_v55 }
 0x360   :  { %v944_v15 = vadd.f32 %v940_v12, %v936_v54 }
 0x362   :  { %v3179_v60 = vmul.f32 %v2495_v27, %v944_v15 }
 0x364   :  { %972 = vmatmul.f32.gmra.mxu2 %v3179_v60 }
 0x365   :  { %v2016_v5 = vpop.eup %2015 }
 0x366   :  { %v937_v21 = vmul.f32 %v2016_v5, %v933_v19  ;;  %v3967_v19 = vld [vmem:[#allocation6_spill] sm:$0xff]  ;;  %v3968_v5 = vld [vmem:[#allocation7_spill] sm:$0xff] }
 0x368   :  { %v945_v11 = vadd.f32 %v941_v22, %v937_v21  ;;  %v3969_v21 = vld [vmem:[#allocation8_spill] sm:$0xff]  ;;  %v3970_v22 = vld [vmem:[#allocation9_spill] sm:$0xff] }
 0x36a   :  { %v3184_v40 = vmul.f32 %v2495_v27, %v945_v11  ;;  %v3971_v11 = vld [vmem:[#allocation10_spill] sm:$0xff] }
 0x36c   :  { %975 = vmatmul.f32.gmra.mxu2 %v3184_v40  ;;  %1008 = vmatpush.msrb.mxu1 %v3184_v40 }
 0x36e   :  { %1009 = vmatpush.msrb.mxu1 %v3179_v60 }
 0x370   :  { %1010 = vmatpush.msrb.mxu1 %v3167_v34 }
 0x372   :  { %1011 = vmatpush.msrb.mxu1 %v3139_v24 }
 0x373   :  { %1888 = vmatmul.msk.f32.vlgmr.msrb.gmra.mxu1 %vm166_vm5, %v2518_v42 }
 0x37b   :  { %1889 = vmatmul.msk.f32.gmra.mxu1 %vm166_vm5, %v2529_v43 }
 0x383   :  { %1890 = vmatmul.msk.f32.gmra.mxu1 %vm166_vm5, %v2540_v44 }
 0x38b   :  { %1891 = vmatmul.msk.f32.gmra.mxu1 %vm166_vm5, %v2551_v45 }
 0x393   :  { %1892 = vmatmul.msk.f32.gmra.mxu1 %vm166_vm5, %v2562_v46 }
 0x39b   :  { %1893 = vmatmul.msk.f32.gmra.mxu1 %vm166_vm5, %v2571_v47 }
 0x3a3   :  { %1894 = vmatmul.msk.f32.gmra.mxu1 %vm166_vm5, %v2578_v48 }
 0x3ab   :  { %1895 = vmatmul.msk.f32.gmra.mxu1 %vm166_vm5, %v2585_v49 }
 0x3b3   :  { %1896 = vmatmul.msk.f32.gmra.mxu1 %vm166_vm5, %v2592_v50 }
 0x3bb   :  { %1897 = vmatmul.msk.f32.gmra.mxu1 %vm166_vm5, %v2599_v51 }
 0x3c3   :  { %1898 = vmatmul.msk.f32.gmra.mxu1 %vm166_vm5, %v2606_v52 }
 0x3cb   :  { %1899 = vmatmul.msk.f32.gmra.mxu1 %vm166_vm5, %v2613_v53 }
 0x3d3   :  { %1900 = vmatmul.msk.f32.gmra.mxu1 %vm166_vm5, %v2640_v57 }
 0x3d7   :  { %v967_v41 = vpop.f32.mrf.mxu2 }
 0x3d8   :  { %v979_v45 = vmul.f32 %v967_v41, %v2769_v6  ;;  %v3972_v41 = vld [vmem:[#allocation11_spill] sm:$0xff] }
 0x3db   :  { %1901 = vmatmul.msk.f32.gmra.mxu1 %vm166_vm5, %v2675_v62 }
 0x3df   :  { %v970_v42 = vpop.f32.mrf.mxu2 }
 0x3e0   :  { %v980_v44 = vmul.f32 %v970_v42, %v2763_v29  ;;  %v3973_v42 = vld [vmem:[#allocation12_spill] sm:$0xff] }
 0x3e2   :  { %v983_v47 = vadd.f32 %v980_v44, %v979_v45  ;;  %v3975_v44 = vld [vmem:[#allocation14_spill] sm:$0xff]  ;;  %v3976_v45 = vld [vmem:[#allocation15_spill] sm:$0xff] }
 0x3e3   :  { %1902 = vmatmul.msk.f32.gmra.mxu1 %vm166_vm5, %v2710_v4 }
 0x3e7   :  { %v973_v43 = vpop.f32.mrf.mxu2 }
 0x3e8   :  { %v981_v46 = vmul.f32 %v973_v43, %v2774_v32  ;;  %v3974_v43 = vld [vmem:[#allocation13_spill] sm:$0xff] }
 0x3ea   :  { %v984_v49 = vadd.f32 %v983_v47, %v981_v46  ;;  %v3977_v46 = vld [vmem:[#allocation16_spill] sm:$0xff] }
 0x3eb   :  { %1903 = vmatmul.msk.f32.gmra.mxu1 %vm166_vm5, %v2750_v28 }
 0x3ef   :  { %v976_v48 = vpop.f32.mrf.mxu2 }
 0x3f0   :  { %v982_v50 = vmul.f32 %v976_v48, %v2784_v9  ;;  %v1013_v9 = vpop.f32.mrf.mxu1 }
 0x3f2   :  { %v985_v51 = vadd.f32 %v984_v49, %v982_v50 }
 0x3f4   :  { %v986_v52 = vrot.slane %v985_v51, 4 }
 0x3f6   :  { %v987_v53 = vadd.f32 %v986_v52, %v985_v51 }
 0x3f8   :  { %v988_v57 = vrot.slane %v987_v53, 2  ;;  %v1016_v30 = vpop.f32.mrf.mxu1 }
 0x3fa   :  { %v989_v62 = vadd.f32 %v988_v57, %v987_v53  ;;  %v3978_v53 = vld [vmem:[#allocation18_spill] sm:$0xff] }
 0x3fc   :  { %v990_v4 = vrot.slane %v989_v62, 1 }
 0x3fe   :  { %v991_v38 = vadd.f32 %v990_v4, %v989_v62  ;;  %v3979_v62 = vld [vmem:[#allocation17_spill] sm:$0xff] }
 0x400   :  { %v992_v29 = vmul.f32 %v991_v38, %v2798_v13  ;;  %v993_v28 = vmul.f32 %v991_v38, %v2807_v16  ;;  %v994_v6 = vmul.f32 %v991_v38, %v2817_v18  ;;  %v995_v32 = vmul.f32 %v991_v38, %v2827_v20  ;;  %v1019_v25 = vpop.f32.mrf.mxu1 }
 0x402   :  { %1077 = vmatmul.f32.vlgmr.msrb.gmra.mxu2 %v992_v29 }
 0x408   :  { %v1022_v17 = vpop.f32.mrf.mxu1 }
 0x40a   :  { %1080 = vmatmul.f32.gmra.mxu2 %v993_v28 }
 0x410   :  { %v1025_v47 = vpop.f32.mrf.mxu1 }
 0x411   :  { %v1159_v4 = vadd.f32 %v1025_v47, %v3979_v62  ;;  %v3989_v47 = vld [vmem:[#allocation25_spill] sm:$0xff] }
 0x412   :  { %1083 = vmatmul.f32.gmra.mxu2 %v994_v6 }
 0x418   :  { %v1028_v48 = vpop.f32.mrf.mxu1 }
 0x41a   :  { %1086 = vmatmul.f32.gmra.mxu2 %v995_v32  ;;  %v3980_v32 = vld [vmem:[#allocation19_spill] sm:$0xff] }
 0x420   :  { %v1031_v49 = vpop.f32.mrf.mxu1 }
 0x428   :  { %v1034_v51 = vpop.f32.mrf.mxu1 }
 0x430   :  { %v1037_v38 = vpop.f32.mrf.mxu1 }
 0x485   :  { %v1078_v26 = vpop.f32.mrf.mxu2 }
 0x486   :  { %v1079_v14 = vadd.f32 %v1078_v26, %v1013_v9  ;;  %v3981_v26 = vld [vmem:[#allocation21_spill] sm:$0xff] }
 0x488   :  { %v1090_v20 = vadd.f32 %v1079_v14, %v2846_v8  ;;  %v3983_v14 = vld [vmem:[#allocation23_spill] sm:$0xff] }
 0x48a   :  { %v1098_v3 = vmul.f32 0.01, %v1090_v20  ;;  %vm1094_vm0 = vcmp.gt.f32.partialorder %v1090_v20, 0.0 }
 0x48c   :  { %v1102_v15 = vsel %vm1094_vm0, %v1090_v20, %v1098_v3  ;;  %v3986_v3 = vld [vmem:[#allocation20_spill] sm:$0xff] }
 0x48d   :  { %v1081_v10 = vpop.f32.mrf.mxu2 }
 0x48e   :  { %v1082_v39 = vadd.f32 %v1081_v10, %v1016_v30  ;;  %v1160_v30 = vadd.f32 %v1028_v48, %v3981_v26  ;;  %v1040_v10 = vpop.f32.mrf.mxu1 }
 0x490   :  { %v1091_v18 = vadd.f32 %v1082_v39, %v2842_v31  ;;  %v3982_v39 = vld [vmem:[#allocation24_spill] sm:$0xff] }
 0x492   :  { %v1099_v54 = vmul.f32 0.01, %v1091_v18  ;;  %vm1095_vm15 = vcmp.gt.f32.partialorder %v1091_v18, 0.0 }
 0x494   :  { %v1103_v58 = vsel %vm1095_vm15, %v1091_v18, %v1099_v54  ;;  %v3985_v54 = vld [vmem:[#allocation26_spill] sm:$0xff] }
 0x495   :  { %v1084_v63 = vpop.f32.mrf.mxu2 }
 0x496   :  { %v1085_v2 = vadd.f32 %v1084_v63, %v1019_v25 }
 0x498   :  { %v1092_v16 = vadd.f32 %v1085_v2, %v2839_v0 }
 0x49a   :  { %v1100_v1 = vmul.f32 0.01, %v1092_v16  ;;  %vm1096_vm14 = vcmp.gt.f32.partialorder %v1092_v16, 0.0 }
 0x49c   :  { %v1104_v12 = vsel %vm1096_vm14, %v1092_v16, %v1100_v1  ;;  %v1161_v16 = vadd.f32 %v1031_v49, %v3983_v14 }
 0x49d   :  { %v1087_v13 = vpop.f32.mrf.mxu2 }
 0x49e   :  { %v1088_v33 = vadd.f32 %v1087_v13, %v1022_v17 }
 0x4a0   :  { %v1093_v7 = vadd.f32 %v1088_v33, %v2837_v61 }
 0x4a2   :  { %v1101_v35 = vmul.f32 0.01, %v1093_v7  ;;  %vm1097_vm13 = vcmp.gt.f32.partialorder %v1093_v7, 0.0 }
 0x4a4   :  { %v1105_v55 = vsel %vm1097_vm13, %v1093_v7, %v1101_v35  ;;  %v1043_v7 = vpop.f32.mrf.mxu1  ;;  %v3984_v35 = vld [vmem:[#allocation22_spill] sm:$0xff] }
 0x4a5   :  { %1118 = vmatpush.msra.mxu2 %v1105_v55  ;;  %v1163_v1 = vadd.f32 %v1037_v38, %v3984_v35 }
 0x4a7   :  { %1119 = vmatpush.msra.mxu2 %v1104_v12 }
 0x4a9   :  { %1120 = vmatpush.msra.mxu2 %v1103_v58 }
 0x4ab   :  { %1121 = vmatpush.msra.mxu2 %v1102_v15 }
 0x4ac   :  { %1904 = vmatmul.msk.f32.vlgmr.msra.gmra.mxu2 %vm166_vm5, %v3966_v37  ;;  %v3987_v37 = vld [vmem:[#allocation27_spill] sm:$0xff] }
 0x4b4   :  { %1905 = vmatmul.msk.f32.gmra.mxu2 %vm166_vm5, %v3967_v19  ;;  %v1162_v19 = vadd.f32 %v1034_v51, %v3987_v37 }
 0x4bc   :  { %1906 = vmatmul.msk.f32.gmra.mxu2 %vm166_vm5, %v3968_v5 }
 0x4c4   :  { %1907 = vmatmul.msk.f32.gmra.mxu2 %vm166_vm5, %v3969_v21 }
 0x4cc   :  { %1908 = vmatmul.msk.f32.gmra.mxu2 %vm166_vm5, %v3970_v22 }
 0x4d4   :  { %1909 = vmatmul.msk.f32.gmra.mxu2 %vm166_vm5, %v3971_v11 }
 0x4dc   :  { %1910 = vmatmul.msk.f32.gmra.mxu2 %vm166_vm5, %v3972_v41 }
 0x4e4   :  { %1911 = vmatmul.msk.f32.gmra.mxu2 %vm166_vm5, %v3973_v42 }
 0x4ec   :  { %1912 = vmatmul.msk.f32.gmra.mxu2 %vm166_vm5, %v3974_v43  ;;  %v3988_v43 = vld [vmem:[#allocation28_spill] sm:$0xff] }
 0x4f4   :  { %1913 = vmatmul.msk.f32.gmra.mxu2 %vm166_vm5, %v3975_v44  ;;  %v1164_v44 = vadd.f32 %v1040_v10, %v3988_v43  ;;  %v3991_v10 = vld [vmem:[#allocation29_spill] sm:$0xff] }
 0x4fc   :  { %1914 = vmatmul.msk.f32.gmra.mxu2 %vm166_vm5, %v3976_v45  ;;  %v1046_v45 = vpop.f32.mrf.mxu1 }
 0x504   :  { %1915 = vmatmul.msk.f32.gmra.mxu2 %vm166_vm5, %v3977_v46 }
 0x52f   :  { %v1123_v50 = vpop.f32.mrf.mxu2 }
 0x530   :  { %v1124_v57 = vadd.f32 %v1123_v50, %v3978_v53 }
 0x532   :  { %v1171_v29 = vadd.f32 %v1159_v4, %v1124_v57 }
 0x534   :  { %v1916_v6 = vmul.f32 -1.442695, %v1171_v29 }
 0x536   :  { %2017 = vpow2.f32 %v1916_v6 }
 0x537   :  { %v1126_v52 = vpop.f32.mrf.mxu2 }
 0x538   :  { %v1127_v9 = vadd.f32 %v1126_v52, %v3980_v32 }
 0x53a   :  { %v1172_v25 = vadd.f32 %v1160_v30, %v1127_v9  ;;  %v3990_v9 = vld [vmem:[#allocation31_spill] sm:$0xff] }
 0x53b   :  { %v1165_v30 = vadd.f32 %v1043_v7, %v3990_v9 }
 0x53c   :  { %v1917_v2 = vmul.f32 -1.442695, %v1172_v25  ;;  %v2018_v13 = vpop.eup %2017 }
 0x53d   :  { %v3265_v18 = vadd.f32 1.0, %v2018_v13 }
 0x53e   :  { %2019 = vpow2.f32 %v1917_v2  ;;  %v1049_v2 = vpop.f32.mrf.mxu1 }
 0x53f   :  { %v1129_v28 = vpop.f32.mrf.mxu2  ;;  %2021 = vrcp.f32 %v3265_v18  ;;  %vm1196_vm2 = vweird.f32 %v3265_v18 }
 0x540   :  { %v1130_v17 = vadd.f32 %v1129_v28, %v3982_v39 }
 0x542   :  { %v1173_v33 = vadd.f32 %v1161_v16, %v1130_v17 }
 0x544   :  { %v1918_v55 = vmul.f32 -1.442695, %v1173_v33  ;;  %v2020_v15 = vpop.eup %2019 }
 0x545   :  { %v3272_v11 = vadd.f32 1.0, %v2020_v15  ;;  %v3274_v41 = vpop.eup %2021 }
 0x546   :  { %2023 = vpow2.f32 %v1918_v55  ;;  %v1192_v51 = vmul.f32 %v3274_v41, %v3265_v18  ;;  %vm1197_vm1 = vweird.f32 %v3274_v41 }
 0x547   :  { %v1132_v63 = vpop.f32.mrf.mxu2  ;;  %vm3315_vm3 = vmor %vm1196_vm2, %vm1197_vm1  ;;  %vm1211_vm6 = vweird.f32 %v3272_v11 }
 0x548   :  { %v1133_v12 = vadd.f32 %v1132_v63, %v3985_v54  ;;  %v1193_v29 = vsub.f32 1.0, %v1192_v51 }
 0x54a   :  { %v1174_v21 = vadd.f32 %v1162_v19, %v1133_v12  ;;  %v1194_v13 = vmul.f32 %v3274_v41, %v1193_v29 }
 0x54c   :  { %v1919_v46 = vmul.f32 -1.442695, %v1174_v21  ;;  %v2024_v49 = vpop.eup %2023 }
 0x54d   :  { %v3281_v4 = vadd.f32 1.0, %v2024_v49  ;;  %v1200_v49 = vand.u32 2147483647, %v3265_v18 }
 0x54f   :  { %v1135_v20 = vpop.f32.mrf.mxu2  ;;  %vm1201_vm4 = vcmp.eq.f32.partialorder %v1200_v49, 8.507059e+37  ;;  %vm1226_vm13 = vweird.f32 %v3281_v4 }
 0x550   :  { %v1136_v58 = vadd.f32 %v1135_v20, %v3986_v3 }
 0x552   :  { %v1251_v5 = vadd.f32 %v1163_v1, %v1136_v58  ;;  %v1195_v58 = vadd.f32 %v3274_v41, %v1194_v13 }
 0x554   :  { %v1920_v22 = vmul.f32 -1.442695, %v1251_v5  ;;  %v3992_v5 = vld [vmem:[#allocation33_spill] sm:$0xff]  ;;  %v1199_v51 = vsel %vm3315_vm3, %v3274_v41, %v1195_v58 }
 0x555   :  { %v1166_v21 = vadd.f32 %v1046_v45, %v3992_v5 }
 0x556   :  { %2025 = vpow2.f32 %v1920_v22 }
 0x557   :  { %v1138_v42 = vpop.f32.mrf.mxu2  ;;  %2027 = vrcp.f32 %v3272_v11 }
 0x558   :  { %v1139_v48 = vadd.f32 %v1138_v42, %v3989_v47  ;;  %2029 = vpow2.f32 %v1919_v46  ;;  %v1202_v42 = vand.u32 2147483648, %v3265_v18  ;;  %v3993_v46 = vld [vmem:[#allocation34_spill] sm:$0xff] }
 0x55a   :  { %v1252_v50 = vadd.f32 %v1164_v44, %v1139_v48  ;;  %v1203_v29 = vor.u32 1.1754944e-38, %v1202_v42 }
 0x55c   :  { %v2026_v52 = vpop.eup %2025  ;;  %v1921_v57 = vmul.f32 -1.442695, %v1252_v50  ;;  %v1204_v41 = vsel %vm1201_vm4, %v1203_v29, %v1199_v51 }
 0x55d   :  { %v3283_v38 = vadd.f32 1.0, %v2026_v52  ;;  %v3285_v28 = vpop.eup %2027 }
 0x55e   :  { %2031 = vpow2.f32 %v1921_v57  ;;  %v2030_v63 = vpop.eup %2029  ;;  %v1207_v16 = vmul.f32 %v3285_v28, %v3272_v11  ;;  %vm1212_vm7 = vweird.f32 %v3285_v28 }
 0x55f   :  { %2033 = vrcp.f32 %v3283_v38  ;;  %v1141_v6 = vpop.f32.mrf.mxu2  ;;  %v3296_v55 = vadd.f32 1.0, %v2030_v63  ;;  %v1052_v63 = vpop.f32.mrf.mxu1  ;;  %v1282_v42 = vand.u32 2147483648, %v3283_v38  ;;  %vm1276_vm9 = vweird.f32 %v3283_v38  ;;  %vm3352_vm10 = vmor %vm1211_vm6, %vm1212_vm7 }
 0x560   :  { %v1142_v25 = vadd.f32 %v1141_v6, %v3991_v10  ;;  %2035 = vrcp.f32 %v3281_v4  ;;  %v1208_v15 = vsub.f32 1.0, %v1207_v16 }
 0x561   :  { %vm1241_vm6 = vweird.f32 %v3296_v55 }
 0x562   :  { %v1253_v17 = vadd.f32 %v1165_v30, %v1142_v25  ;;  %v1209_v52 = vmul.f32 %v3285_v28, %v1208_v15  ;;  %v3996_v30 = vld [vmem:[#allocation30_spill] sm:$0xff] }
 0x563   :  { %v1167_v25 = vadd.f32 %v1049_v2, %v3996_v30 }
 0x564   :  { %v2032_v33 = vpop.eup %2031  ;;  %v1922_v20 = vmul.f32 -1.442695, %v1253_v17  ;;  %v1210_v2 = vadd.f32 %v3285_v28, %v1209_v52  ;;  %v1280_v52 = vand.u32 2147483647, %v3283_v38 }
 0x565   :  { %v3294_v1 = vpop.eup %2033  ;;  %v3298_v12 = vadd.f32 1.0, %v2032_v33  ;;  %v1215_v33 = vand.u32 2147483647, %v3272_v11  ;;  %v1331_v50 = vmul.f32 %v1204_v41, %v1167_v25 }
 0x566   :  { %v1272_v7 = vmul.f32 %v3294_v1, %v3283_v38  ;;  %2037 = vpow2.f32 %v1922_v20  ;;  %v3304_v19 = vpop.eup %2035  ;;  %vm1277_vm8 = vweird.f32 %v3294_v1  ;;  %vm1281_vm14 = vcmp.eq.f32.partialorder %v1280_v52, 8.507059e+37 }
 0x567   :  { %2039 = vrcp.f32 %v3298_v12  ;;  %v1144_v22 = vpop.f32.mrf.mxu2  ;;  %v1222_v57 = vmul.f32 %v3304_v19, %v3281_v4  ;;  %vm3356_vm11 = vmor %vm1276_vm9, %vm1277_vm8  ;;  %vm1216_vm12 = vcmp.eq.f32.partialorder %v1215_v33, 8.507059e+37  ;;  %vm1227_vm15 = vweird.f32 %v3304_v19 }
 0x568   :  { %v1273_v44 = vsub.f32 1.0, %v1272_v7  ;;  %v1145_v48 = vadd.f32 %v1144_v22, %v3993_v46  ;;  %2041 = vrcp.f32 %v3296_v55  ;;  %v1217_v22 = vand.u32 2147483648, %v3272_v11  ;;  %vm3391_vm1 = vmor %vm1226_vm13, %vm1227_vm15 }
 0x569   :  { %v1223_v7 = vsub.f32 1.0, %v1222_v57  ;;  %vm1291_vm2 = vweird.f32 %v3298_v12 }
 0x56a   :  { %v1254_v45 = vadd.f32 %v1166_v21, %v1145_v48  ;;  %v1274_v18 = vmul.f32 %v3294_v1, %v1273_v44  ;;  %v3997_v48 = vld [vmem:[#allocation32_spill] sm:$0xff] }
 0x56b   :  { %v1224_v25 = vmul.f32 %v3304_v19, %v1223_v7 }
 0x56c   :  { %v2038_v6 = vpop.eup %2037  ;;  %v1923_v17 = vmul.f32 -1.442695, %v1254_v45  ;;  %v1275_v21 = vadd.f32 %v3294_v1, %v1274_v18  ;;  %v3998_v45 = vld [vmem:[#allocation35_spill] sm:$0xff] }
 0x56d   :  { %v3328_v13 = vpop.eup %2039  ;;  %v3330_v16 = vadd.f32 1.0, %v2038_v6  ;;  %v1168_v51 = vadd.f32 %v1052_v63, %v3998_v45  ;;  %v1214_v6 = vsel %vm3352_vm10, %v3285_v28, %v1210_v2  ;;  %v1218_v63 = vor.u32 1.1754944e-38, %v1217_v22 }
 0x56e   :  { %v1287_v20 = vmul.f32 %v3328_v13, %v3298_v12  ;;  %2043 = vpow2.f32 %v1923_v17  ;;  %v3337_v58 = vpop.eup %2041  ;;  %v1279_v11 = vsel %vm3356_vm11, %v3294_v1, %v1275_v21  ;;  %v1232_v28 = vand.u32 2147483648, %v3281_v4  ;;  %v1055_v1 = vpop.f32.mrf.mxu1 }
 0x56f   :  { %2045 = vrcp.f32 %v3330_v16  ;;  %v1147_v15 = vpop.f32.mrf.mxu2  ;;  %v1237_v38 = vmul.f32 %v3337_v58, %v3296_v55  ;;  %v1225_v22 = vadd.f32 %v3304_v19, %v1224_v25  ;;  %vm1292_vm0 = vweird.f32 %v3328_v13 }
 0x570   :  { %v1288_v44 = vsub.f32 1.0, %v1287_v20  ;;  %v1148_v49 = vadd.f32 %v1147_v15, %v3997_v48  ;;  %v1283_v20 = vor.u32 1.1754944e-38, %v1282_v42  ;;  %v1219_v15 = vsel %vm1216_vm12, %v1218_v63, %v1214_v6  ;;  %v4003_v6 = vld [vmem:[#allocation36_spill] sm:$0xff]  ;;  %vm3403_vm3 = vmor %vm1291_vm2, %vm1292_vm0 }
 0x571   :  { %v1238_v42 = vsub.f32 1.0, %v1237_v38  ;;  %v1332_v18 = vmul.f32 %v1219_v15, %v1168_v51  ;;  %v1295_v38 = vand.u32 2147483647, %v3298_v12  ;;  %v1229_v51 = vsel %vm3391_vm1, %v3304_v19, %v1225_v22 }
 0x572   :  { %v1335_v29 = vadd.f32 %v1331_v50, %v1148_v49  ;;  %v1289_v17 = vmul.f32 %v3328_v13, %v1288_v44  ;;  %v1284_v21 = vsel %vm1281_vm14, %v1283_v20, %v1279_v11  ;;  %v1230_v49 = vand.u32 2147483647, %v3281_v4 }
 0x573   :  { %v1169_v11 = vadd.f32 %v1055_v1, %v4003_v6  ;;  %v1343_v63 = vsub.f32 1.0, %v1284_v21  ;;  %v1233_v20 = vor.u32 1.1754944e-38, %v1232_v28  ;;  %v1239_v15 = vmul.f32 %v3337_v58, %v1238_v42 }
 0x574   :  { %v2044_v41 = vpop.eup %2043  ;;  %2047 = vtanh.f32 %v1335_v29  ;;  %v1290_v50 = vadd.f32 %v3328_v13, %v1289_v17  ;;  %v1297_v29 = vand.u32 2147483648, %v3298_v12  ;;  %vm1231_vm4 = vcmp.eq.f32.partialorder %v1230_v49, 8.507059e+37 }
 0x575   :  { %v3372_v2 = vpop.eup %2045  ;;  %v3374_v7 = vadd.f32 1.0, %v2044_v41  ;;  %v1234_v22 = vsel %vm1231_vm4, %v1233_v20, %v1229_v51  ;;  %vm1296_vm7 = vcmp.eq.f32.partialorder %v1295_v38, 8.507059e+37  ;;  %vm1242_vm8 = vweird.f32 %v3337_v58 }
 0x576   :  { %v1302_v33 = vmul.f32 %v3372_v2, %v3330_v16  ;;  %v1294_v12 = vsel %vm3403_vm3, %v3328_v13, %v1290_v50  ;;  %v1298_v19 = vor.u32 1.1754944e-38, %v1297_v29  ;;  %vm1307_vm9 = vweird.f32 %v3372_v2  ;;  %vm3431_vm10 = vmor %vm1241_vm6, %vm1242_vm8 }
 0x577   :  { %2049 = vrcp.f32 %v3374_v7  ;;  %v1150_v44 = vpop.f32.mrf.mxu2  ;;  %v1333_v25 = vmul.f32 %v1234_v22, %v1169_v11  ;;  %v1312_v38 = vand.u32 2147483648, %v3330_v16  ;;  %vm1306_vm11 = vweird.f32 %v3330_v16 }
 0x578   :  { %v1303_v52 = vsub.f32 1.0, %v1302_v33  ;;  %v1151_v57 = vadd.f32 %v1150_v44, %v3092_v59  ;;  %v1351_v33 = vmul.f32 %v1284_v21, %v3139_v24  ;;  %v1240_v21 = vadd.f32 %v3337_v58, %v1239_v15  ;;  %vm1308_vm12 = vmor %vm1306_vm11, %vm1307_vm9 }
 0x579   :  { %v1299_v13 = vsel %vm1296_vm7, %v1298_v19, %v1294_v12  ;;  %v1310_v51 = vand.u32 2147483647, %v3330_v16  ;;  %v1313_v19 = vor.u32 1.1754944e-38, %v1312_v38  ;;  %vm1321_vm0 = vweird.f32 %v3374_v7 }
 0x57a   :  { %v2048_v17 = vpop.eup %2047  ;;  %v1336_v41 = vadd.f32 %v1332_v18, %v1151_v57  ;;  %v1304_v44 = vmul.f32 %v3372_v2, %v1303_v52  ;;  %v1247_v57 = vand.u32 2147483648, %v3296_v55  ;;  %v1245_v52 = vand.u32 2147483647, %v3296_v55 }
 0x57b   :  { %v1347_v1 = vmul.f32 %v2048_v17, %v1343_v63  ;;  %v1244_v11 = vsel %vm3431_vm10, %v3337_v58, %v1240_v21  ;;  %v1352_v55 = vmul.f32 %v1299_v13, %v3167_v34  ;;  %vm1311_vm14 = vcmp.eq.f32.partialorder %v1310_v51, 8.507059e+37 }
 0x57c   :  { %2051 = vtanh.f32 %v1336_v41  ;;  %v1305_v18 = vadd.f32 %v3372_v2, %v1304_v44  ;;  %v1344_v41 = vsub.f32 1.0, %v1299_v13  ;;  %v1248_v4 = vor.u32 1.1754944e-38, %v1247_v57 }
 0x57d   :  { %v3413_v28 = vpop.eup %2049  ;;  %v1355_v42 = vadd.f32 %v1351_v33, %v1347_v1  ;;  %v1058_v1 = vpop.f32.mrf.mxu1  ;;  %vm1246_vm13 = vcmp.eq.f32.partialorder %v1245_v52, 8.507059e+37  ;;  %v1327_v13 = vand.u32 2147483648, %v3374_v7  ;;  %v1325_v52 = vand.u32 2147483647, %v3374_v7 }
 0x57e   :  { %v1317_v24 = vmul.f32 %v3413_v28, %v3374_v7  ;;  %v1309_v12 = vsel %vm1308_vm12, %v3372_v2, %v1305_v18  ;;  %v1249_v16 = vsel %vm1246_vm13, %v1248_v4, %v1244_v11  ;;  %vm1322_vm15 = vweird.f32 %v3413_v28 }
 0x57f   :  { %v1153_v50 = vpop.f32.mrf.mxu2  ;;  %v3421_v49 = vmul.f32 %v2495_v27, %v1355_v42  ;;  %v1170_v42 = vadd.f32 %v1058_v1, %v3161_v36  ;;  %vm1323_vm1 = vmor %vm1321_vm0, %vm1322_vm15  ;;  %v1328_v17 = vor.u32 1.1754944e-38, %v1327_v13  ;;  %vm1326_vm2 = vcmp.eq.f32.partialorder %v1325_v52, 8.507059e+37 }
 0x580   :  { %v1318_v29 = vsub.f32 1.0, %v1317_v24  ;;  %v1154_v63 = vadd.f32 %v1153_v50, %v3136_v56  ;;  %v1314_v24 = vsel %vm1311_vm14, %v1313_v19, %v1309_v12  ;;  %v2101_v12 = vld [vmem:[%s3864_s10 + $0x20] sm:$0xff]  ;;  %v2103_v19 = vld [vmem:[%s3864_s10 + $0x30] sm:$0xff] }
 0x581   :  { %1379 = vmatmul.f32.vlgmr.msra.gmra.mxu3 %v3421_v49  ;;  %v1334_v2 = vmul.f32 %v1249_v16, %v1170_v42  ;;  %v1345_v50 = vsub.f32 1.0, %v1314_v24  ;;  %v2104_v16 = vld [vmem:[%s3864_s10 + $0x38] sm:$0xff]  ;;  %v2106_v42 = vld [vmem:[%s3864_s10 + $0x48] sm:$0xff] }
 0x582   :  { %v2052_v20 = vpop.eup %2051  ;;  %v1337_v15 = vadd.f32 %v1333_v25, %v1154_v63  ;;  %v1319_v44 = vmul.f32 %v3413_v28, %v1318_v29  ;;  %v1353_v25 = vmul.f32 %v1314_v24, %v3179_v60  ;;  %v2107_v24 = vld [vmem:[%s3864_s10 + $0x50] sm:$0xff] }
 0x583   :  { %v1348_v33 = vmul.f32 %v2052_v20, %v1344_v41 }
 0x584   :  { %2053 = vtanh.f32 %v1337_v15  ;;  %v1320_v21 = vadd.f32 %v3413_v28, %v1319_v44  ;;  %v2102_v44 = vld [vmem:[%s3864_s10 + $0x28] sm:$0xff] }
 0x585   :  { %v1356_v22 = vadd.f32 %v1352_v55, %v1348_v33  ;;  %v2099_v33 = vld [vmem:[%s3864_s10 + $0x10] sm:$0xff]  ;;  %v2100_v55 = vld [vmem:[%s3864_s10 + $0x18] sm:$0xff] }
 0x586   :  { %v1324_v38 = vsel %vm1323_vm1, %v3413_v28, %v1320_v21  ;;  %v2097_v28 = vld [vmem:[%s3864_s10] sm:$0xff] }
 0x587   :  { %v1156_v58 = vpop.f32.mrf.mxu2  ;;  %v3445_v57 = vmul.f32 %v2495_v27, %v1356_v22  ;;  %v1329_v51 = vsel %vm1326_vm2, %v1328_v17, %v1324_v38  ;;  %v2105_v22 = vld [vmem:[%s3864_s10 + $0x40] sm:$0xff]  ;;  %v2115_v17 = vld [vmem:[%s3856_s2 + $0x10] sm:$0xff] }
 0x588   :  { %v1157_v34 = vadd.f32 %v1156_v58, %v3164_v23  ;;  %v1346_v15 = vsub.f32 1.0, %v1329_v51  ;;  %v1354_v4 = vmul.f32 %v1329_v51, %v3184_v40  ;;  %v2098_v40 = vld [vmem:[%s3864_s10 + $0x8] sm:$0xff]  ;;  %v2108_v58 = vld [vmem:[%s3864_s10 + $0x58] sm:$0xff]  ;;  %v2109_v21 = vld [vmem:[%s3864_s10 + $0x60] sm:$0xff] }
 0x589   :  { %1382 = vmatmul.f32.gmra.mxu3 %v3445_v57 }
 0x58a   :  { %v2054_v18 = vpop.eup %2053  ;;  %v1338_v29 = vadd.f32 %v1334_v2, %v1157_v34  ;;  %v2110_v2 = vld [vmem:[%s3864_s10 + $0x68] sm:$0xff] }
 0x58b   :  { %v1349_v63 = vmul.f32 %v2054_v18, %v1345_v50  ;;  %v2111_v50 = vld [vmem:[%s3864_s10 + $0x70] sm:$0xff]  ;;  %v2112_v18 = vld [vmem:[%s3856_s2 + $0x8] sm:$0xff] }
 0x58c   :  { %2055 = vtanh.f32 %v1338_v29 }
 0x58d   :  { %v1357_v41 = vadd.f32 %v1353_v25, %v1349_v63  ;;  %v2113_v63 = vld [vmem:[%s3864_s10 + $0x78] sm:$0xff]  ;;  %v2114_v25 = vld [vmem:[%s3856_s2] sm:$0xff] }
 0x58f   :  { %v3457_v20 = vmul.f32 %v2495_v27, %v1357_v41 }
 0x591   :  { %1385 = vmatmul.f32.gmra.mxu3 %v3457_v20 }
 0x592   :  { %v2056_v7 = vpop.eup %2055 }
 0x593   :  { %v1350_v11 = vmul.f32 %v2056_v7, %v1346_v15 }
 0x595   :  { %v1358_v1 = vadd.f32 %v1354_v4, %v1350_v11  ;;  %v2116_v11 = vld [vmem:[%s3856_s2 + $0x18] sm:$0xff] }
 0x597   :  { %v3462_v60 = vmul.f32 %v2495_v27, %v1358_v1 }
 0x599   :  { %1388 = vmatmul.f32.gmra.mxu3 %v3462_v60  ;;  %1421 = vmatpush.msrb.mxu0 %v3462_v60 }
 0x59b   :  { %1422 = vmatpush.msrb.mxu0 %v3457_v20 }
 0x59d   :  { %1423 = vmatpush.msrb.mxu0 %v3445_v57 }
 0x59f   :  { %1424 = vmatpush.msrb.mxu0 %v3421_v49 }
 0x5a0   :  { %1924 = vmatmul.msk.f32.vlgmr.msrb.gmra.mxu0 %vm166_vm5, %v2097_v28 }
 0x5a8   :  { %1925 = vmatmul.msk.f32.gmra.mxu0 %vm166_vm5, %v2098_v40 }
 0x5b0   :  { %1926 = vmatmul.msk.f32.gmra.mxu0 %vm166_vm5, %v2099_v33 }
 0x5b8   :  { %1927 = vmatmul.msk.f32.gmra.mxu0 %vm166_vm5, %v2100_v55 }
 0x5c0   :  { %1928 = vmatmul.msk.f32.gmra.mxu0 %vm166_vm5, %v2101_v12 }
 0x5c8   :  { %1929 = vmatmul.msk.f32.gmra.mxu0 %vm166_vm5, %v2102_v44 }
 0x5d0   :  { %1930 = vmatmul.msk.f32.gmra.mxu0 %vm166_vm5, %v2103_v19  ;;  %v2117_v19 = vld [vmem:[%s3857_s3] sm:$0xff] }
 0x5d8   :  { %1931 = vmatmul.msk.f32.gmra.mxu0 %vm166_vm5, %v2104_v16 }
 0x5e0   :  { %1932 = vmatmul.msk.f32.gmra.mxu0 %vm166_vm5, %v2105_v22  ;;  %v2118_v22 = vld [vmem:[%s3857_s3 + $0x8] sm:$0xff] }
 0x5e8   :  { %1933 = vmatmul.msk.f32.gmra.mxu0 %vm166_vm5, %v2106_v42 }
 0x5f0   :  { %1934 = vmatmul.msk.f32.gmra.mxu0 %vm166_vm5, %v2107_v24  ;;  %v2119_v24 = vld [vmem:[%s3857_s3 + $0x10] sm:$0xff] }
 0x5f8   :  { %1935 = vmatmul.msk.f32.gmra.mxu0 %vm166_vm5, %v2108_v58 }
 0x600   :  { %1936 = vmatmul.msk.f32.gmra.mxu0 %vm166_vm5, %v2109_v21  ;;  %v2120_v21 = vld [vmem:[%s3857_s3 + $0x18] sm:$0xff] }
 0x604   :  { %v1380_v34 = vpop.f32.mrf.mxu3 }
 0x605   :  { %v1392_v38 = vmul.f32 %v2114_v25, %v1380_v34 }
 0x608   :  { %1937 = vmatmul.msk.f32.gmra.mxu0 %vm166_vm5, %v2110_v2 }
 0x60c   :  { %v1383_v13 = vpop.f32.mrf.mxu3 }
 0x60d   :  { %v1393_v29 = vmul.f32 %v2112_v18, %v1383_v13 }
 0x60f   :  { %v1396_v51 = vadd.f32 %v1393_v29, %v1392_v38 }
 0x610   :  { %1938 = vmatmul.msk.f32.gmra.mxu0 %vm166_vm5, %v2111_v50 }
 0x614   :  { %v1386_v52 = vpop.f32.mrf.mxu3 }
 0x615   :  { %v1394_v41 = vmul.f32 %v2115_v17, %v1386_v52 }
 0x617   :  { %v1397_v7 = vadd.f32 %v1396_v51, %v1394_v41 }
 0x618   :  { %1939 = vmatmul.msk.f32.gmra.mxu0 %vm166_vm5, %v2113_v63 }
 0x61c   :  { %v1389_v15 = vpop.f32.mrf.mxu3 }
 0x61d   :  { %v1395_v4 = vmul.f32 %v2116_v11, %v1389_v15  ;;  %v1426_v2 = vpop.f32.mrf.mxu0 }
 0x61f   :  { %v1398_v1 = vadd.f32 %v1397_v7, %v1395_v4 }
 0x621   :  { %v1399_v28 = vrot.slane %v1398_v1, 4 }
 0x623   :  { %v1400_v40 = vadd.f32 %v1399_v28, %v1398_v1 }
 0x625   :  { %v1401_v33 = vrot.slane %v1400_v40, 2  ;;  %v1429_v50 = vpop.f32.mrf.mxu0 }
 0x627   :  { %v1402_v55 = vadd.f32 %v1401_v33, %v1400_v40 }
 0x629   :  { %v1403_v12 = vrot.slane %v1402_v55, 1 }
 0x62b   :  { %v1404_v44 = vadd.f32 %v1403_v12, %v1402_v55 }
 0x62d   :  { %v1405_v16 = vmul.f32 %v2117_v19, %v1404_v44  ;;  %v1406_v42 = vmul.f32 %v2118_v22, %v1404_v44  ;;  %v1407_v58 = vmul.f32 %v2119_v24, %v1404_v44  ;;  %v1408_v34 = vmul.f32 %v2120_v21, %v1404_v44  ;;  %v1432_v18 = vpop.f32.mrf.mxu0  ;;  %v2124_v19 = vld [vmem:[%s3866_s12 + $0x18] sm:$0xff]  ;;  %v2126_v22 = vld [vmem:[%s3866_s12 + $0x28] sm:$0xff] }
 0x62e   :  { %v2128_v24 = vld [vmem:[%s3866_s12 + $0x38] sm:$0xff]  ;;  %v2130_v21 = vld [vmem:[%s3866_s12 + $0x48] sm:$0xff] }
 0x62f   :  { %1490 = vmatmul.f32.vlgmr.msrb.gmra.mxu3 %v1405_v16  ;;  %v2125_v16 = vld [vmem:[%s3866_s12 + $0x20] sm:$0xff] }
 0x635   :  { %v1435_v38 = vpop.f32.mrf.mxu0 }
 0x637   :  { %1493 = vmatmul.f32.gmra.mxu3 %v1406_v42  ;;  %v2127_v42 = vld [vmem:[%s3866_s12 + $0x30] sm:$0xff] }
 0x63f   :  { %1496 = vmatmul.f32.gmra.mxu3 %v1407_v58  ;;  %v2129_v58 = vld [vmem:[%s3866_s12 + $0x40] sm:$0xff] }
 0x647   :  { %1499 = vmatmul.f32.gmra.mxu3 %v1408_v34  ;;  %v2131_v34 = vld [vmem:[%s3866_s12 + $0x50] sm:$0xff] }
 0x6b2   :  { %v1491_v13 = vpop.f32.mrf.mxu3 }
 0x6b3   :  { %v1492_v41 = vadd.f32 %v1491_v13, %v1426_v2  ;;  %v2132_v2 = vld [vmem:[%s3866_s12 + $0x58] sm:$0xff]  ;;  %v1438_v13 = vpop.f32.mrf.mxu0 }
 0x6b5   :  { %v1503_v4 = vadd.f32 %v1492_v41, %v2846_v8  ;;  %v2123_v8 = vld [vmem:[%s3866_s12 + $0x10] sm:$0xff] }
 0x6b7   :  { %v1511_v12 = vmul.f32 0.01, %v1503_v4  ;;  %vm1507_vm7 = vcmp.gt.f32.partialorder %v1503_v4, 0.0 }
 0x6b9   :  { %v1515_v44 = vsel %vm1507_vm7, %v1503_v4, %v1511_v12  ;;  %v1791_v4 = vld [vmem:[%s3859_s5 + $0x78] sm:$0xff] }
 0x6ba   :  { %v1494_v52 = vpop.f32.mrf.mxu3  ;;  %1792 = vmatpush.msra.mxu3 %v1791_v4  ;;  %v1778_v4 = vld [vmem:[%s3859_s5 + $0x10] sm:$0xff] }
 0x6bb   :  { %v1495_v25 = vadd.f32 %v1494_v52, %v1429_v50  ;;  %v1441_v50 = vpop.f32.mrf.mxu0 }
 0x6bd   :  { %v1504_v7 = vadd.f32 %v1495_v25, %v2842_v31  ;;  %v2122_v31 = vld [vmem:[%s3866_s12 + $0x8] sm:$0xff] }
 0x6bf   :  { %v1512_v33 = vmul.f32 0.01, %v1504_v7  ;;  %vm1508_vm6 = vcmp.gt.f32.partialorder %v1504_v7, 0.0 }
 0x6c2   :  { %v1497_v29 = vpop.f32.mrf.mxu3 }
 0x6c3   :  { %v1498_v63 = vadd.f32 %v1497_v29, %v1432_v18  ;;  %v1444_v52 = vpop.f32.mrf.mxu0 }
 0x6c4   :  { %v1574_v12 = vadd.f32 %v1444_v52, %v3983_v14  ;;  %v1785_v14 = vld [vmem:[%s3859_s5 + $0x48] sm:$0xff] }
 0x6c5   :  { %v1505_v51 = vadd.f32 %v1498_v63, %v2839_v0  ;;  %v1516_v0 = vsel %vm1508_vm6, %v1504_v7, %v1512_v33  ;;  %v1788_v33 = vld [vmem:[%s3859_s5 + $0x60] sm:$0xff]  ;;  %v1781_v52 = vld [vmem:[%s3859_s5 + $0x28] sm:$0xff] }
 0x6c7   :  { %v1513_v28 = vmul.f32 0.01, %v1505_v51  ;;  %vm1509_vm4 = vcmp.gt.f32.partialorder %v1505_v51, 0.0 }
 0x6c9   :  { %v1517_v55 = vsel %vm1509_vm4, %v1505_v51, %v1513_v28 }
 0x6ca   :  { %v1500_v17 = vpop.f32.mrf.mxu3 }
 0x6cb   :  { %v1501_v15 = vadd.f32 %v1500_v17, %v1435_v38  ;;  %v1447_v29 = vpop.f32.mrf.mxu0  ;;  %v1572_v38 = vadd.f32 %v1438_v13, %v3979_v62  ;;  %v1782_v13 = vld [vmem:[%s3859_s5 + $0x30] sm:$0xff] }
 0x6cd   :  { %v1506_v11 = vadd.f32 %v1501_v15, %v2837_v61  ;;  %v2121_v61 = vld [vmem:[%s3866_s12] sm:$0xff] }
 0x6cf   :  { %v1514_v1 = vmul.f32 0.01, %v1506_v11  ;;  %vm1510_vm3 = vcmp.gt.f32.partialorder %v1506_v11, 0.0 }
 0x6d1   :  { %v1518_v40 = vsel %vm1510_vm3, %v1506_v11, %v1514_v1  ;;  %v1573_v11 = vadd.f32 %v1441_v50, %v3981_v26 }
 0x6d2   :  { %1531 = vmatpush.msra.mxu1 %v1518_v40 }
 0x6d3   :  { %v1450_v17 = vpop.f32.mrf.mxu0 }
 0x6d4   :  { %1532 = vmatpush.msra.mxu1 %v1517_v55 }
 0x6d6   :  { %1533 = vmatpush.msra.mxu1 %v1516_v0  ;;  %v1787_v0 = vld [vmem:[%s3859_s5 + $0x58] sm:$0xff] }
 0x6d8   :  { %1534 = vmatpush.msra.mxu1 %v1515_v44 }
 0x6d9   :  { %1940 = vmatmul.msk.f32.vlgmr.msra.gmra.mxu1 %vm166_vm5, %v2121_v61 }
 0x6db   :  { %v1453_v1 = vpop.f32.mrf.mxu0 }
 0x6e1   :  { %1941 = vmatmul.msk.f32.gmra.mxu1 %vm166_vm5, %v2122_v31 }
 0x6e3   :  { %v1456_v31 = vpop.f32.mrf.mxu0 }
 0x6e9   :  { %1942 = vmatmul.msk.f32.gmra.mxu1 %vm166_vm5, %v2123_v8 }
 0x6f1   :  { %1943 = vmatmul.msk.f32.gmra.mxu1 %vm166_vm5, %v2124_v19  ;;  %v1576_v19 = vadd.f32 %v1450_v17, %v3984_v35  ;;  %v1783_v35 = vld [vmem:[%s3859_s5 + $0x38] sm:$0xff] }
 0x6f9   :  { %1944 = vmatmul.msk.f32.gmra.mxu1 %vm166_vm5, %v2125_v16 }
 0x701   :  { %1945 = vmatmul.msk.f32.gmra.mxu1 %vm166_vm5, %v2126_v22 }
 0x709   :  { %1946 = vmatmul.msk.f32.gmra.mxu1 %vm166_vm5, %v2127_v42 }
 0x711   :  { %1947 = vmatmul.msk.f32.gmra.mxu1 %vm166_vm5, %v2128_v24  ;;  %v1784_v24 = vld [vmem:[%s3859_s5 + $0x40] sm:$0xff] }
 0x719   :  { %1948 = vmatmul.msk.f32.gmra.mxu1 %vm166_vm5, %v2129_v58 }
 0x721   :  { %1949 = vmatmul.msk.f32.gmra.mxu1 %vm166_vm5, %v2130_v21  ;;  %v1575_v21 = vadd.f32 %v1447_v29, %v3987_v37  ;;  %v1459_v29 = vpop.f32.mrf.mxu0 }
 0x729   :  { %1950 = vmatmul.msk.f32.gmra.mxu1 %vm166_vm5, %v2131_v34 }
 0x731   :  { %1951 = vmatmul.msk.f32.gmra.mxu1 %vm166_vm5, %v2132_v2 }
 0x756   :  { %v1536_v18 = vpop.f32.mrf.mxu1 }
 0x757   :  { %v1537_v25 = vadd.f32 %v1536_v18, %v3978_v53  ;;  %v1790_v53 = vld [vmem:[%s3859_s5 + $0x70] sm:$0xff]  ;;  %v1577_v18 = vadd.f32 %v1453_v1, %v3988_v43  ;;  %v1779_v43 = vld [vmem:[%s3859_s5 + $0x18] sm:$0xff] }
 0x758   :  { %1793 = vmatpush.msra.mxu3 %v1790_v53 }
 0x759   :  { %v1584_v41 = vadd.f32 %v1572_v38, %v1537_v25  ;;  %v1780_v38 = vld [vmem:[%s3859_s5 + $0x20] sm:$0xff] }
 0x75b   :  { %v1952_v15 = vmul.f32 -1.442695, %v1584_v41 }
 0x75d   :  { %2057 = vpow2.f32 %v1952_v15 }
 0x75e   :  { %v1539_v63 = vpop.f32.mrf.mxu1 }
 0x75f   :  { %v1540_v7 = vadd.f32 %v1539_v63, %v3980_v32  ;;  %v1789_v32 = vld [vmem:[%s3859_s5 + $0x68] sm:$0xff] }
 0x760   :  { %1794 = vmatpush.msra.mxu3 %v1789_v32  ;;  %v1578_v32 = vadd.f32 %v1456_v31, %v3990_v9 }
 0x761   :  { %v1585_v28 = vadd.f32 %v1573_v11, %v1540_v7 }
 0x762   :  { %1795 = vmatpush.msra.mxu3 %v1788_v33 }
 0x763   :  { %v1953_v40 = vmul.f32 -1.442695, %v1585_v28  ;;  %v2058_v55 = vpop.eup %2057 }
 0x764   :  { %1796 = vmatpush.msra.mxu3 %v1787_v0  ;;  %v3630_v61 = vadd.f32 1.0, %v2058_v55  ;;  %v1462_v55 = vpop.f32.mrf.mxu0 }
 0x765   :  { %2059 = vpow2.f32 %v1953_v40 }
 0x766   :  { %v1542_v51 = vpop.f32.mrf.mxu1  ;;  %2061 = vrcp.f32 %v3630_v61  ;;  %vm1609_vm8 = vweird.f32 %v3630_v61 }
 0x767   :  { %v1543_v26 = vadd.f32 %v1542_v51, %v3982_v39  ;;  %v1786_v39 = vld [vmem:[%s3859_s5 + $0x50] sm:$0xff] }
 0x768   :  { %1797 = vmatpush.msra.mxu3 %v1786_v39 }
 0x769   :  { %v1586_v44 = vadd.f32 %v1574_v12, %v1543_v26  ;;  %v1776_v26 = vld [vmem:[%s3859_s5] sm:$0xff] }
 0x76a   :  { %1798 = vmatpush.msra.mxu3 %v1785_v14 }
 0x76b   :  { %v1954_v16 = vmul.f32 -1.442695, %v1586_v44  ;;  %v2060_v58 = vpop.eup %2059 }
 0x76c   :  { %1799 = vmatpush.msra.mxu3 %v1784_v24  ;;  %v3654_v50 = vpop.eup %2061 }
 0x76d   :  { %2063 = vpow2.f32 %v1954_v16  ;;  %v1605_v51 = vmul.f32 %v3654_v50, %v3630_v61  ;;  %vm1610_vm5 = vweird.f32 %v3654_v50 }
 0x76e   :  { %v1545_v62 = vpop.f32.mrf.mxu1  ;;  %1800 = vmatpush.msra.mxu3 %v1783_v35  ;;  %v1613_v35 = vand.u32 2147483647, %v3630_v61  ;;  %vm3713_vm9 = vmor %vm1609_vm8, %vm1610_vm5 }
 0x76f   :  { %v1546_v22 = vadd.f32 %v1545_v62, %v3985_v54  ;;  %v1606_v1 = vsub.f32 1.0, %v1605_v51  ;;  %v1777_v62 = vld [vmem:[%s3859_s5 + $0x8] sm:$0xff]  ;;  %s2161_s5 = smov [#allocation2]  }
 0x770   :  { %1801 = vmatpush.msra.mxu3 %v1782_v13  ;;  %vm1614_vm10 = vcmp.eq.f32.partialorder %v1613_v35, 8.507059e+37  ;;  %s1829_s1 = sshll.u32 %s2161_s5, 4  ;;  %s1830_s1 = int_to_ptr.vmem [resolvable:$true] %s1829_s1 }
 0x771   :  { %v1587_v54 = vadd.f32 %v1575_v21, %v1546_v22  ;;  %v1607_v0 = vmul.f32 %v3654_v50, %v1606_v1 }
 0x772   :  { %1802 = vmatpush.msra.mxu3 %v1781_v52 }
 0x773   :  { %v1955_v63 = vmul.f32 -1.442695, %v1587_v54  ;;  %v2064_v17 = vpop.eup %2063 }
 0x774   :  { %1803 = vmatpush.msra.mxu3 %v1780_v38  ;;  %v3670_v7 = vadd.f32 1.0, %v2064_v17 }
 0x776   :  { %v1548_v8 = vpop.f32.mrf.mxu1  ;;  %1804 = vmatpush.msra.mxu3 %v1779_v43  ;;  %vm1639_vm2 = vweird.f32 %v3670_v7  ;;  %v1643_v35 = vand.u32 2147483647, %v3670_v7 }
 0x777   :  { %v1549_v42 = vadd.f32 %v1548_v8, %v3986_v3  ;;  %v3649_v3 = vadd.f32 1.0, %v2060_v58  ;;  %v1615_v58 = vand.u32 2147483648, %v3630_v61 }
 0x778   :  { %1805 = vmatpush.msra.mxu3 %v1778_v4 }
 0x779   :  { %v1664_v34 = vadd.f32 %v1576_v19, %v1549_v42  ;;  %v1608_v19 = vadd.f32 %v3654_v50, %v1607_v0  ;;  %v1579_v42 = vadd.f32 %v1459_v29, %v3992_v5  ;;  %v1465_v29 = vpop.f32.mrf.mxu0  ;;  %vm1624_vm11 = vweird.f32 %v3649_v3 }
 0x77a   :  { %1806 = vmatpush.msra.mxu3 %v1777_v62  ;;  %v1628_v17 = vand.u32 2147483647, %v3649_v3  ;;  %v1630_v4 = vand.u32 2147483648, %v3649_v3 }
 0x77b   :  { %v1956_v2 = vmul.f32 -1.442695, %v1664_v34 }
 0x77c   :  { %1807 = vmatpush.msra.mxu3 %v1776_v26  ;;  %vm1629_vm1 = vcmp.eq.f32.partialorder %v1628_v17, 8.507059e+37  ;;  %v1631_v0 = vor.u32 1.1754944e-38, %v1630_v4 }
 0x77d   :  { %2065 = vpow2.f32 %v1956_v2  ;;  %v1612_v2 = vsel %vm3713_vm9, %v3654_v50, %v1608_v19  ;;  %vm1644_vm9 = vcmp.eq.f32.partialorder %v1643_v35, 8.507059e+37 }
 0x77e   :  { %v1551_v37 = vpop.f32.mrf.mxu1  ;;  %2067 = vrcp.f32 %v3649_v3 }
 0x77f   :  { %v1552_v25 = vadd.f32 %v1551_v37, %v3989_v47  ;;  %2069 = vpow2.f32 %v1955_v63  ;;  %v1616_v37 = vor.u32 1.1754944e-38, %v1615_v58 }
 0x781   :  { %v1665_v41 = vadd.f32 %v1577_v18, %v1552_v25  ;;  %v1580_v18 = vadd.f32 %v1462_v55, %v3996_v30  ;;  %v1617_v50 = vsel %vm1614_vm10, %v1616_v37, %v1612_v2 }
 0x783   :  { %v2066_v15 = vpop.eup %2065  ;;  %v1957_v47 = vmul.f32 -1.442695, %v1665_v41 }
 0x784   :  { %v3672_v11 = vadd.f32 1.0, %v2066_v15  ;;  %v3677_v28 = vpop.eup %2067 }
 0x785   :  { %2071 = vpow2.f32 %v1957_v47  ;;  %v2070_v33 = vpop.eup %2069  ;;  %v1620_v44 = vmul.f32 %v3677_v28, %v3649_v3  ;;  %vm1625_vm12 = vweird.f32 %v3677_v28 }
 0x786   :  { %2073 = vrcp.f32 %v3672_v11  ;;  %v1554_v53 = vpop.f32.mrf.mxu1  ;;  %v1695_v1 = vand.u32 2147483648, %v3672_v11  ;;  %vm1689_vm14 = vweird.f32 %v3672_v11  ;;  %v1693_v26 = vand.u32 2147483647, %v3672_v11  ;;  %vm3750_vm15 = vmor %vm1624_vm11, %vm1625_vm12 }
 0x787   :  { %v1555_v40 = vadd.f32 %v1554_v53, %v3991_v10  ;;  %2075 = vrcp.f32 %v3670_v7  ;;  %v3694_v10 = vadd.f32 1.0, %v2070_v33  ;;  %v1621_v16 = vsub.f32 1.0, %v1620_v44 }
 0x788   :  { %vm1694_vm3 = vcmp.eq.f32.partialorder %v1693_v26, 8.507059e+37 }
 0x789   :  { %v1666_v12 = vadd.f32 %v1578_v32, %v1555_v40  ;;  %v1622_v13 = vmul.f32 %v3677_v28, %v1621_v16  ;;  %v1744_v32 = vmul.f32 %v1617_v50, %v1580_v18  ;;  %v1581_v40 = vadd.f32 %v1465_v29, %v3998_v45 }
 0x78a   :  { %vm1654_vm10 = vweird.f32 %v3694_v10  ;;  %v1660_v4 = vand.u32 2147483648, %v3694_v10 }
 0x78b   :  { %v2072_v39 = vpop.eup %2071  ;;  %v1958_v9 = vmul.f32 -1.442695, %v1666_v12  ;;  %v1623_v30 = vadd.f32 %v3677_v28, %v1622_v13 }
 0x78c   :  { %v3692_v31 = vpop.eup %2073  ;;  %v3696_v8 = vadd.f32 1.0, %v2072_v39 }
 0x78d   :  { %v1685_v14 = vmul.f32 %v3692_v31, %v3672_v11  ;;  %2077 = vpow2.f32 %v1958_v9  ;;  %v3702_v22 = vpop.eup %2075  ;;  %vm1690_vm13 = vweird.f32 %v3692_v31  ;;  %v1627_v45 = vsel %vm3750_vm15, %v3677_v28, %v1623_v30 }
 0x78e   :  { %2079 = vrcp.f32 %v3696_v8  ;;  %v1557_v24 = vpop.f32.mrf.mxu1  ;;  %vm3754_vm0 = vmor %vm1689_vm14, %vm1690_vm13  ;;  %v1696_v9 = vor.u32 1.1754944e-38, %v1695_v1  ;;  %v1645_v28 = vand.u32 2147483648, %v3670_v7  ;;  %v1632_v16 = vsel %vm1629_vm1, %v1631_v0, %v1627_v45 }
 0x78f   :  { %v1686_v21 = vsub.f32 1.0, %v1685_v14  ;;  %v1558_v34 = vadd.f32 %v1557_v24, %v3993_v46  ;;  %2081 = vrcp.f32 %v3694_v10  ;;  %v1635_v46 = vmul.f32 %v3702_v22, %v3670_v7 }
 0x790   :  { %vm1640_vm4 = vweird.f32 %v3702_v22  ;;  %v1745_v13 = vmul.f32 %v1632_v16, %v1581_v40  ;;  %vm1704_vm5 = vweird.f32 %v3696_v8  ;;  %v1708_v18 = vand.u32 2147483647, %v3696_v8 }
 0x791   :  { %v1667_v5 = vadd.f32 %v1579_v42, %v1558_v34  ;;  %v1687_v61 = vmul.f32 %v3692_v31, %v1686_v21  ;;  %v1636_v51 = vsub.f32 1.0, %v1635_v46  ;;  %v1710_v46 = vand.u32 2147483648, %v3696_v8  ;;  %vm3789_vm7 = vmor %vm1639_vm2, %vm1640_vm4 }
 0x792   :  { %vm1709_vm11 = vcmp.eq.f32.partialorder %v1708_v18, 8.507059e+37 }
 0x793   :  { %v2078_v52 = vpop.eup %2077  ;;  %v1959_v63 = vmul.f32 -1.442695, %v1667_v5  ;;  %v1688_v47 = vadd.f32 %v3692_v31, %v1687_v61  ;;  %v1637_v12 = vmul.f32 %v3702_v22, %v1636_v51 }
 0x794   :  { %v3726_v25 = vpop.eup %2079  ;;  %v3728_v38 = vadd.f32 1.0, %v2078_v52 }
 0x795   :  { %v1700_v41 = vmul.f32 %v3726_v25, %v3696_v8  ;;  %2083 = vpow2.f32 %v1959_v63  ;;  %v3735_v43 = vpop.eup %2081  ;;  %v1692_v3 = vsel %vm3754_vm0, %v3692_v31, %v1688_v47  ;;  %v1468_v31 = vpop.f32.mrf.mxu0  ;;  %v1638_v58 = vadd.f32 %v3702_v22, %v1637_v12 }
 0x796   :  { %2085 = vrcp.f32 %v3728_v38  ;;  %v1560_v15 = vpop.f32.mrf.mxu1  ;;  %v1650_v11 = vmul.f32 %v3735_v43, %v3694_v10  ;;  %v1697_v24 = vsel %vm1694_vm3, %v1696_v9, %v1692_v3  ;;  %vm1705_vm6 = vweird.f32 %v3726_v25 }
 0x797   :  { %v1701_v53 = vsub.f32 1.0, %v1700_v41  ;;  %v1561_v62 = vadd.f32 %v1560_v15, %v3997_v48  ;;  %v1582_v61 = vadd.f32 %v1468_v31, %v4003_v6  ;;  %v1756_v37 = vsub.f32 1.0, %v1697_v24  ;;  %vm3801_vm8 = vmor %vm1704_vm5, %vm1705_vm6 }
 0x798   :  { %v1651_v21 = vsub.f32 1.0, %v1650_v11  ;;  %v1642_v63 = vsel %vm3789_vm7, %v3702_v22, %v1638_v58  ;;  %v1646_v6 = vor.u32 1.1754944e-38, %v1645_v28  ;;  %v1764_v41 = vmul.f32 %v1697_v24, %v3421_v49 }
 0x799   :  { %v1748_v48 = vadd.f32 %v1744_v32, %v1561_v62  ;;  %v1702_v44 = vmul.f32 %v3726_v25, %v1701_v53  ;;  %v1711_v22 = vor.u32 1.1754944e-38, %v1710_v46  ;;  %vm1655_vm12 = vweird.f32 %v3735_v43 }
 0x79a   :  { %v1652_v50 = vmul.f32 %v3735_v43, %v1651_v21  ;;  %v1647_v47 = vsel %vm1644_vm9, %v1646_v6, %v1642_v63  ;;  %v1658_v32 = vand.u32 2147483647, %v3694_v10  ;;  %vm3826_vm14 = vmor %vm1654_vm10, %vm1655_vm12  ;;  %vm1719_vm15 = vweird.f32 %v3728_v38 }
 0x79b   :  { %v2084_v39 = vpop.eup %2083  ;;  %2087 = vtanh.f32 %v1748_v48  ;;  %v1703_v54 = vadd.f32 %v3726_v25, %v1702_v44  ;;  %v1746_v55 = vmul.f32 %v1647_v47, %v1582_v61  ;;  %v1725_v48 = vand.u32 2147483648, %v3728_v38 }
 0x79c   :  { %v3770_v14 = vpop.eup %2085  ;;  %v3772_v19 = vadd.f32 1.0, %v2084_v39  ;;  %v1653_v1 = vadd.f32 %v3735_v43, %v1652_v50  ;;  %v1723_v11 = vand.u32 2147483647, %v3728_v38  ;;  %v1661_v44 = vor.u32 1.1754944e-38, %v1660_v4 }
 0x79d   :  { %v1715_v42 = vmul.f32 %v3770_v14, %v3728_v38  ;;  %v1707_v8 = vsel %vm3801_vm8, %v3726_v25, %v1703_v54  ;;  %vm1720_vm13 = vweird.f32 %v3770_v14  ;;  %v1471_v39 = vpop.f32.mrf.mxu0  ;;  %vm1659_vm1 = vcmp.eq.f32.partialorder %v1658_v32, 8.507059e+37 }
 0x79e   :  { %2089 = vrcp.f32 %v3772_v19  ;;  %v1563_v34 = vpop.f32.mrf.mxu1  ;;  %v1712_v25 = vsel %vm1709_vm11, %v1711_v22, %v1707_v8  ;;  %vm1721_vm0 = vmor %vm1719_vm15, %vm1720_vm13  ;;  %v1726_v31 = vor.u32 1.1754944e-38, %v1725_v48  ;;  %vm1724_vm2 = vcmp.eq.f32.partialorder %v1723_v11, 8.507059e+37 }
 0x79f   :  { %v1716_v5 = vsub.f32 1.0, %v1715_v42  ;;  %v1564_v2 = vadd.f32 %v1563_v34, %v3092_v59  ;;  %v1757_v12 = vsub.f32 1.0, %v1712_v25  ;;  %v1765_v10 = vmul.f32 %v1712_v25, %v3445_v57 }
 0x7a0   :  { %v1583_v24 = vadd.f32 %v1471_v39, %v3161_v36  ;;  %v1740_v35 = vand.u32 2147483648, %v3772_v19  ;;  %vm1734_vm4 = vweird.f32 %v3772_v19 }
 0x7a1   :  { %v2088_v29 = vpop.eup %2087  ;;  %v1749_v59 = vadd.f32 %v1745_v13, %v1564_v2  ;;  %v1717_v30 = vmul.f32 %v3770_v14, %v1716_v5  ;;  %v1738_v5 = vand.u32 2147483647, %v3772_v19 }
 0x7a2   :  { %v1760_v17 = vmul.f32 %v2088_v29, %v1756_v37  ;;  %v1741_v37 = vor.u32 1.1754944e-38, %v1740_v35 }
 0x7a3   :  { %2091 = vtanh.f32 %v1749_v59  ;;  %v1718_v40 = vadd.f32 %v3770_v14, %v1717_v30  ;;  %vm1739_vm7 = vcmp.eq.f32.partialorder %v1738_v5, 8.507059e+37 }
 0x7a4   :  { %v3811_v51 = vpop.eup %2089  ;;  %v1768_v15 = vadd.f32 %v1764_v41, %v1760_v17 }
 0x7a5   :  { %v1730_v49 = vmul.f32 %v3811_v51, %v3772_v19  ;;  %v1722_v28 = vsel %vm1721_vm0, %v3770_v14, %v1718_v40  ;;  %vm1735_vm3 = vweird.f32 %v3811_v51 }
 0x7a6   :  { %v1566_v53 = vpop.f32.mrf.mxu1  ;;  %v1772_v62 = vmul.f32 %v2495_v27, %v1768_v15  ;;  %v1727_v58 = vsel %vm1724_vm2, %v1726_v31, %v1722_v28  ;;  %vm1736_vm6 = vmor %vm1734_vm4, %vm1735_vm3 }
 0x7a7   :  { %v1731_v26 = vsub.f32 1.0, %v1730_v49  ;;  %v1567_v33 = vadd.f32 %v1566_v53, %v3136_v56  ;;  %v1657_v56 = vsel %vm3826_vm14, %v3735_v43, %v1653_v1  ;;  %v1758_v54 = vsub.f32 1.0, %v1727_v58 }
 0x7a8   :  { %1808 = vmatmul.f32.vlgmr.msra.gmra.mxu3 %v1772_v62  ;;  %v1662_v38 = vsel %vm1659_vm1, %v1661_v44, %v1657_v56  ;;  %v1766_v46 = vmul.f32 %v1727_v58, %v3457_v20 }
 0x7a9   :  { %v2092_v3 = vpop.eup %2091  ;;  %v1750_v0 = vadd.f32 %v1746_v55, %v1567_v33  ;;  %v1732_v16 = vmul.f32 %v3811_v51, %v1731_v26  ;;  %v1747_v14 = vmul.f32 %v1662_v38, %v1583_v24 }
 0x7aa   :  { %v1761_v9 = vmul.f32 %v2092_v3, %v1757_v12 }
 0x7ab   :  { %2093 = vtanh.f32 %v1750_v0  ;;  %v1733_v34 = vadd.f32 %v3811_v51, %v1732_v16 }
 0x7ac   :  { %v1769_v42 = vadd.f32 %v1765_v10, %v1761_v9 }
 0x7ad   :  { %v1737_v61 = vsel %vm1736_vm6, %v3811_v51, %v1733_v34 }
 0x7ae   :  { %v1569_v43 = vpop.f32.mrf.mxu1  ;;  %v1773_v21 = vmul.f32 %v2495_v27, %v1769_v42  ;;  %v1742_v52 = vsel %vm1739_vm7, %v1741_v37, %v1737_v61 }
 0x7af   :  { %v1570_v57 = vadd.f32 %v1569_v43, %v3164_v23  ;;  %v1759_v29 = vsub.f32 1.0, %v1742_v52  ;;  %v1767_v19 = vmul.f32 %v1742_v52, %v3462_v60 }
 0x7b0   :  { %1811 = vmatmul.f32.gmra.mxu3 %v1773_v21 }
 0x7b1   :  { %v2094_v36 = vpop.eup %2093  ;;  %v1751_v2 = vadd.f32 %v1747_v14, %v1570_v57 }
 0x7b2   :  { %v1762_v13 = vmul.f32 %v2094_v36, %v1758_v54 }
 0x7b3   :  { %2095 = vtanh.f32 %v1751_v2 }
 0x7b4   :  { %v1770_v23 = vadd.f32 %v1766_v46, %v1762_v13 }
 0x7b6   :  { %v1774_v18 = vmul.f32 %v2495_v27, %v1770_v23 }
 0x7b8   :  { %1814 = vmatmul.f32.gmra.mxu3 %v1774_v18 }
 0x7b9   :  { %v2096_v59 = vpop.eup %2095 }
 0x7ba   :  { %v1763_v63 = vmul.f32 %v2096_v59, %v1759_v29 }
 0x7bc   :  { %v1771_v6 = vadd.f32 %v1767_v19, %v1763_v63 }
 0x7be   :  { %v1775_v50 = vmul.f32 %v2495_v27, %v1771_v6 }
 0x7c0   :  { %1817 = vmatmul.f32.gmra.mxu3 %v1775_v50 }
 0x82b   :  { %v1809_v20 = vpop.f32.mrf.mxu3 }
 0x82c   :  { %1821 = vst [vmem:[#allocation2] sm:$0xff] %v1809_v20 }
 0x833   :  { %v1812_v7 = vpop.f32.mrf.mxu3 }
 0x834   :  { %1822 = vst [vmem:[#allocation2 + $0x8] sm:$0xff] %v1812_v7 }
 0x83b   :  { %v1815_v17 = vpop.f32.mrf.mxu3 }
 0x83c   :  { %1823 = vst [vmem:[#allocation2 + $0x10] sm:$0xff] %v1815_v17 }
 0x843   :  { %v1818_v41 = vpop.f32.mrf.mxu3 }
 0x844   :  { %1824 = vst [vmem:[#allocation2 + $0x18] sm:$0xff] %v1818_v41 }
 0x845   :  { %1837 = dma.vmem_to_hbm [thread:$0]  %s1830_s1, 512, %s1832_s30, [#allocation3], %s2162_s16, %s2162_s16, %s2163_s17  }
 0x846   :  { %2157 = dma.done.wait [#allocation3], 512  }
 0x847   :  { %2158 = vsyncadd [#allocation3], 4294966784 }
 0x848   :  { %1842 = vsyncpa [#allocation3], 1 }

</bundles_post_ra>
